<compile_context>
chip_gen: v7x
topology: tpu7x:2x2x1
jax: 0.10.0
libtpu: 0.0.40
codegen_flags: <defaults>
</compile_context>

<pallas_src>
import numpy as np
import jax
import jax.numpy as jnp
from jax import lax
from jax.experimental import pallas as pl
from jax.experimental.pallas import tpu as pltpu


def _fast_recip(x):
    # EUP approx reciprocal + one Newton refinement step: lands in the EUP
    # VLIW slot and is ~f32-accurate, so the discrete argmax / threshold
    # decisions match exact division in practice (values within ~1 ulp of the
    # `overlap < threshold` boundary could in principle flip).
    r = pl.reciprocal(x, approx=True)
    return r * (2.0 - x * r)


def _make_kernel(n_obj, n_det, threshold, neg_pos_ratio, alpha):
    f32 = jnp.float32

    def kernel(boxes_ref, boxlabT_ref, detT_ref, scores_ref, out_ref):
        # boxes_ref   : (n_obj, 4)  f32   [x1, y1, x2, y2]
        # boxlabT_ref : (8, n_obj)  f32   rows 0..3 = coords^T, row 4 = labels, 5..7 = 0
        # detT_ref    : (4, n_det)  f32   detections along the 128-lane axis
        # scores_ref  : (1, n_det)  f32   detection scores in [0, 1]
        # out_ref     : (1, 1)      f32   scalar loss

        # ---- box coordinates (hoisted once) ----------------------------------
        bx1 = boxes_ref[:, 0:1]
        by1 = boxes_ref[:, 1:2]
        bx2 = boxes_ref[:, 2:3]
        by2 = boxes_ref[:, 3:4]
        dx1 = detT_ref[0:1, :]
        dy1 = detT_ref[1:2, :]
        dx2 = detT_ref[2:3, :]
        dy2 = detT_ref[3:4, :]

        # ---- Jaccard overlap (IoU) matrix: (n_obj, n_det) ---------------------
        ix1 = jnp.maximum(bx1, dx1)
        iy1 = jnp.maximum(by1, dy1)
        ix2 = jnp.minimum(bx2, dx2)
        iy2 = jnp.minimum(by2, dy2)
        inter = jnp.maximum(ix2 - ix1, 0.0) * jnp.maximum(iy2 - iy1, 0.0)
        area_b = (bx2 - bx1) * (by2 - by1)          # (n_obj, 1)
        area_d = (dx2 - dx1) * (dy2 - dy1)          # (1, n_det)
        overlap = inter * _fast_recip(area_b + area_d - inter)   # (n_obj, n_det)

        row_o = lax.broadcasted_iota(jnp.int32, (n_obj, n_det), 0)
        col_d = lax.broadcasted_iota(jnp.int32, (n_obj, n_det), 1)

        # ---- overlap.max(dim=0): best object per detection --------------------
        best_ovl_det = jnp.max(overlap, axis=0, keepdims=True)                  # (1, n_det)
        obj_per_det = jnp.min(
            jnp.where(overlap == best_ovl_det, row_o, n_obj), axis=0, keepdims=True)

        # ---- overlap.max(dim=1): best detection per object ---------------------
        best_ovl_obj = jnp.max(overlap, axis=1, keepdims=True)                  # (n_obj, 1)
        det_per_obj = jnp.min(
            jnp.where(overlap == best_ovl_obj, col_d, n_det), axis=1, keepdims=True)

        # ---- force-assign each object to its best detection (last write wins) --
        forced = jnp.max(jnp.where(det_per_obj == col_d, row_o, -1),
                         axis=0, keepdims=True)                                  # (1, n_det)
        is_forced = forced >= 0
        obj_per_det = jnp.where(is_forced, forced, obj_per_det)
        ovl_per_det = jnp.where(is_forced, 1.0, best_ovl_det)

        # ---- gather labels + true locations in ONE MXU matmul -------------------
        onehot = (row_o == obj_per_det).astype(f32)                              # (n_obj, n_det)
        gathered = jnp.dot(boxlabT_ref[...], onehot,
                           preferred_element_type=f32)                           # (8, n_det)
        true_locT = gathered[0:4, :]                                             # (4, n_det)
        label_per_det = gathered[4:5, :]                                         # (1, n_det)
        label_per_det = jnp.where(ovl_per_det < threshold, 0.0, label_per_det)

        positive = label_per_det != 0.0                                          # (1, n_det)
        pos_f = positive.astype(f32)
        neg_f = 1.0 - pos_f
        n_pos = jnp.sum(pos_f, keepdims=True)                                    # (1, 1)
        inv_npos = _fast_recip(n_pos)

        # ---- localization loss: mean |det_box - true_loc| over positives --------
        abs_sum = jnp.sum(jnp.abs(detT_ref[...] - true_locT),
                          axis=0, keepdims=True)                                 # (1, n_det)
        loc_loss = jnp.sum(abs_sum * pos_f, keepdims=True) * (0.25 * inv_npos)   # (1, 1)

        # ---- confidence loss ------------------------------------------------------
        conf_all = 1.0 - scores_ref[...]                                         # (1, n_det)
        conf_pos_sum = jnp.sum(conf_all * pos_f, keepdims=True)                  # (1, 1)
        conf_neg = conf_all * neg_f                                              # (1, n_det), >= 0

        # ---- hard-negative top-k sum via bit-exact threshold bisection ------------
        # conf_neg >= 0 (scores are probabilities), so non-negative f32 values
        # order-match their int32 bit patterns.  31 high-to-low bit decisions
        # recover the exact bit pattern of the k-th largest conf_neg value t;
        #     top-k sum = sum(conf_neg > t) + t * (k - count(conf_neg > t)).
        # Ties at the cut all equal t exactly, so this equals the reference's
        # sorted-top-k sum.  k > n_det degenerates to t == 0 and the formula
        # returns sum(conf_neg), which is also what the reference produces.
        # Cost: 31 * (one (1, n_det) VPU compare + one XLU lane reduce); no
        # (n_det, n_det) temporaries, so no re-tiling needed on any generation.
        k = neg_pos_ratio * n_pos                                                # (1, 1)
        bits = pltpu.bitcast(conf_neg, jnp.int32)                                # (1, n_det)
        ans = jnp.zeros((1, 1), jnp.int32)
        for bit in range(30, -1, -1):   # static unroll: shift amounts are constants
            cand = ans | jnp.int32(1 << bit)
            cnt = jnp.sum((bits >= cand).astype(f32), axis=1, keepdims=True)
            ans = jnp.where(cnt >= k, cand, ans)
        t = pltpu.bitcast(ans, f32)                                              # (1, 1)
        gt = conf_neg > t                                                        # (1, n_det)
        count_gt = jnp.sum(gt.astype(f32), keepdims=True)                        # (1, 1)
        sum_gt = jnp.sum(jnp.where(gt, conf_neg, 0.0), keepdims=True)            # (1, 1)
        hard_neg_sum = sum_gt + t * (k - count_gt)                               # (1, 1)

        conf_loss = (hard_neg_sum + conf_pos_sum) * inv_npos                     # (1, 1)
        out_ref[...] = conf_loss + alpha * loc_loss

    return kernel


def attack_loss_v1(det_boxes, det_scores, det_labels, boxes, labels,
                   threshold=0.5, neg_pos_ratio=3, alpha=1.0):
    """Mirrors AttackLoss_v1.forward: inputs are lists of per-image tensors;
    only image 0 is used (as in the reference `for i in range(1)` loop)."""
    del det_labels  # unused by the reference forward pass
    b = jnp.asarray(boxes[0], jnp.float32)                       # (n_obj, 4)
    d = jnp.asarray(det_boxes[0], jnp.float32)                   # (n_det, 4)
    lab = jnp.asarray(labels[0], jnp.float32).reshape(1, -1)     # (1, n_obj)
    sc = jnp.asarray(det_scores[0], jnp.float32)                 # (n_det,)

    n_obj = b.shape[0]
    n_det = d.shape[0]

    d_t = d.T                                                    # (4, n_det)
    sc_row = sc.reshape(1, n_det)
    # (8, n_obj): rows 0..3 = coords^T, row 4 = labels (as f32), rows 5..7 = 0,
    # so the label gather folds into the same MXU matmul as the box gather.
    box_lab_t = jnp.concatenate(
        [b.T, lab, jnp.zeros((3, n_obj), jnp.float32)], axis=0)

    kernel = _make_kernel(n_obj, n_det, float(threshold),
                          float(neg_pos_ratio), float(alpha))
    vmem = pl.BlockSpec(memory_space=pltpu.MemorySpace.VMEM)
    # No vmem_limit override: with the bisection top-k the in-kernel working
    # set is a few (n_obj, n_det)/(1, n_det) rows (< 1 MiB even at n_det=8732),
    # far below the default scoped VMEM on v5e/v6e/v7x.  Inputs stay untiled
    # (all <= ~140 KiB at SSD scale); the bottleneck is in-kernel VPU work.
    out = pl.pallas_call(
        kernel,
        out_shape=jax.ShapeDtypeStruct((1, 1), jnp.float32),
        in_specs=[vmem, vmem, vmem, vmem],
        out_specs=vmem,
    )(b, box_lab_t, d_t, sc_row)
    return out[0, 0]


def _reference_loss(det_boxes, det_scores, boxes, labels,
                    threshold=0.5, neg_pos_ratio=3, alpha=1.0):
    """Plain numpy re-implementation of the PyTorch forward for validation."""
    det_boxes = np.asarray(det_boxes, np.float32)
    det_scores = np.asarray(det_scores, np.float32)
    boxes = np.asarray(boxes, np.float32)
    labels = np.asarray(labels, np.int64)
    n_obj = boxes.shape[0]

    lt = np.maximum(boxes[:, None, :2], det_boxes[None, :, :2])
    rb = np.minimum(boxes[:, None, 2:], det_boxes[None, :, 2:])
    wh = np.clip(rb - lt, 0.0, None)
    inter = wh[..., 0] * wh[..., 1]
    area_b = (boxes[:, 2] - boxes[:, 0]) * (boxes[:, 3] - boxes[:, 1])
    area_d = (det_boxes[:, 2] - det_boxes[:, 0]) * (det_boxes[:, 3] - det_boxes[:, 1])
    overlap = inter / (area_b[:, None] + area_d[None, :] - inter)

    ovl_det = overlap.max(axis=0)
    obj_det = overlap.argmax(axis=0)
    det_obj = overlap.argmax(axis=1)
    obj_det[det_obj] = np.arange(n_obj)
    ovl_det[det_obj] = 1.0
    lab_det = labels[obj_det].copy()
    lab_det[ovl_det < threshold] = 0
    pos = lab_det != 0
    true_loc = boxes[obj_det]
    loc_loss = np.abs(det_boxes[pos] - true_loc[pos]).mean()
    n_pos = int(pos.sum())
    conf_all = 1.0 - det_scores
    conf_pos = conf_all[pos]
    conf_neg = conf_all.copy()
    conf_neg[pos] = 0.0
    conf_neg_sorted = np.sort(conf_neg)[::-1]
    hard = conf_neg_sorted[:neg_pos_ratio * n_pos]
    conf_loss = (hard.sum() + conf_pos.sum()) / float(n_pos)
    return np.float32(conf_loss + alpha * loc_loss)


if __name__ == "__main__":
    n_obj, n_det = 8, 128
    key = jax.random.PRNGKey(0)
    k1, k2, k3, k4 = jax.random.split(key, 4)

    def make_boxes(k, n):
        cxcy = jax.random.uniform(k, (n, 2), minval=0.2, maxval=0.8)
        wh = jax.random.uniform(jax.random.fold_in(k, 1), (n, 2),
                                minval=0.05, maxval=0.3)
        return jnp.concatenate([cxcy - wh / 2.0, cxcy + wh / 2.0], axis=1)

    boxes0 = make_boxes(k1, n_obj)                                   # (8, 4)
    det_boxes0 = make_boxes(k2, n_det)                               # (128, 4)
    labels0 = jax.random.randint(k3, (n_obj,), 1, 21)                # (8,)  classes 1..20
    det_scores0 = jax.random.uniform(k4, (n_det,), minval=0.0, maxval=1.0)  # (128,)
    det_labels0 = jnp.ones((n_det,), jnp.int32)                      # unused, as in reference

    loss = attack_loss_v1([det_boxes0], [det_scores0], [det_labels0],
                          [boxes0], [labels0])
    loss = jax.block_until_ready(loss)

    ref = _reference_loss(det_boxes0, det_scores0, boxes0, labels0)
    assert np.isfinite(float(loss))
    np.testing.assert_allclose(float(loss), float(ref), rtol=1e-3, atol=1e-3)
    print("KERNEL_OK")
</pallas_src>

<mosaic_0001>
module attributes {stable_mosaic.version = 11 : i64} {
  func.func @kernel(%arg0: memref<8x4xf32, #tpu.memory_space<vmem>>, %arg1: memref<8x8xf32, #tpu.memory_space<vmem>>, %arg2: memref<4x128xf32, #tpu.memory_space<vmem>>, %arg3: memref<1x128xf32, #tpu.memory_space<vmem>>, %arg4: memref<1x1xf32, #tpu.memory_space<vmem>>) attributes {dimension_semantics = [], scalar_prefetch = 0 : i64, scratch_operands = 0 : i64, tpu.core_type = #tpu.core_type<tc>} {
    %c0 = arith.constant 0 : index
    %c0_0 = arith.constant 0 : index
    %0 = vector.load %arg0[%c0, %c0_0] : memref<8x4xf32, #tpu.memory_space<vmem>>, vector<8x1xf32>
    %c0_1 = arith.constant 0 : index
    %c1 = arith.constant 1 : index
    %1 = vector.load %arg0[%c0_1, %c1] : memref<8x4xf32, #tpu.memory_space<vmem>>, vector<8x1xf32>
    %c0_2 = arith.constant 0 : index
    %c2 = arith.constant 2 : index
    %2 = vector.load %arg0[%c0_2, %c2] : memref<8x4xf32, #tpu.memory_space<vmem>>, vector<8x1xf32>
    %c0_3 = arith.constant 0 : index
    %c3 = arith.constant 3 : index
    %3 = vector.load %arg0[%c0_3, %c3] : memref<8x4xf32, #tpu.memory_space<vmem>>, vector<8x1xf32>
    %c0_4 = arith.constant 0 : index
    %c0_5 = arith.constant 0 : index
    %4 = vector.load %arg2[%c0_4, %c0_5] : memref<4x128xf32, #tpu.memory_space<vmem>>, vector<1x128xf32>
    %c1_6 = arith.constant 1 : index
    %c0_7 = arith.constant 0 : index
    %5 = vector.load %arg2[%c1_6, %c0_7] : memref<4x128xf32, #tpu.memory_space<vmem>>, vector<1x128xf32>
    %c2_8 = arith.constant 2 : index
    %c0_9 = arith.constant 0 : index
    %6 = vector.load %arg2[%c2_8, %c0_9] : memref<4x128xf32, #tpu.memory_space<vmem>>, vector<1x128xf32>
    %c3_10 = arith.constant 3 : index
    %c0_11 = arith.constant 0 : index
    %7 = vector.load %arg2[%c3_10, %c0_11] : memref<4x128xf32, #tpu.memory_space<vmem>>, vector<1x128xf32>
    %8 = vector.broadcast %0 : vector<8x1xf32> to vector<8x128xf32>
    %9 = vector.broadcast %4 : vector<1x128xf32> to vector<8x128xf32>
    %10 = arith.maximumf %8, %9 : vector<8x128xf32>
    %11 = vector.broadcast %1 : vector<8x1xf32> to vector<8x128xf32>
    %12 = vector.broadcast %5 : vector<1x128xf32> to vector<8x128xf32>
    %13 = arith.maximumf %11, %12 : vector<8x128xf32>
    %14 = vector.broadcast %2 : vector<8x1xf32> to vector<8x128xf32>
    %15 = vector.broadcast %6 : vector<1x128xf32> to vector<8x128xf32>
    %16 = arith.minimumf %14, %15 : vector<8x128xf32>
    %17 = vector.broadcast %3 : vector<8x1xf32> to vector<8x128xf32>
    %18 = vector.broadcast %7 : vector<1x128xf32> to vector<8x128xf32>
    %19 = arith.minimumf %17, %18 : vector<8x128xf32>
    %20 = arith.subf %16, %10 : vector<8x128xf32>
    %cst = arith.constant 0.000000e+00 : f32
    %21 = vector.broadcast %cst : f32 to vector<8x128xf32>
    %22 = arith.maximumf %20, %21 : vector<8x128xf32>
    %23 = arith.subf %19, %13 : vector<8x128xf32>
    %cst_12 = arith.constant 0.000000e+00 : f32
    %24 = vector.broadcast %cst_12 : f32 to vector<8x128xf32>
    %25 = arith.maximumf %23, %24 : vector<8x128xf32>
    %26 = arith.mulf %22, %25 : vector<8x128xf32>
    %27 = arith.subf %2, %0 : vector<8x1xf32>
    %28 = arith.subf %3, %1 : vector<8x1xf32>
    %29 = arith.mulf %27, %28 : vector<8x1xf32>
    %30 = arith.subf %6, %4 : vector<1x128xf32>
    %31 = arith.subf %7, %5 : vector<1x128xf32>
    %32 = arith.mulf %30, %31 : vector<1x128xf32>
    %33 = vector.broadcast %29 : vector<8x1xf32> to vector<8x128xf32>
    %34 = vector.broadcast %32 : vector<1x128xf32> to vector<8x128xf32>
    %35 = arith.addf %33, %34 : vector<8x128xf32>
    %36 = arith.subf %35, %26 : vector<8x128xf32>
    %37 = tpu.reciprocal %36 {approx = true} : vector<8x128xf32> -> vector<8x128xf32>
    %38 = arith.mulf %36, %37 : vector<8x128xf32>
    %cst_13 = arith.constant 2.000000e+00 : f32
    %39 = vector.broadcast %cst_13 : f32 to vector<8x128xf32>
    %40 = arith.subf %39, %38 : vector<8x128xf32>
    %41 = arith.mulf %37, %40 : vector<8x128xf32>
    %42 = arith.mulf %26, %41 : vector<8x128xf32>
    %43 = tpu.iota {dimensions = array<i32: 0>} : vector<8x128xi32>
    %44 = tpu.iota {dimensions = array<i32: 1>} : vector<8x128xi32>
    %cst_14 = arith.constant dense<0xFF800000> : vector<128xf32>
    %45 = vector.multi_reduction <maximumf>, %42, %cst_14 [0] : vector<8x128xf32> to vector<128xf32>
    %46 = vector.shape_cast %45 : vector<128xf32> to vector<1x128xf32>
    %47 = vector.broadcast %46 : vector<1x128xf32> to vector<8x128xf32>
    %48 = arith.cmpf oeq, %42, %47 : vector<8x128xf32>
    %c8_i32 = arith.constant 8 : i32
    %49 = vector.broadcast %c8_i32 : i32 to vector<8x128xi32>
    %50 = arith.select %48, %43, %49 : vector<8x128xi1>, vector<8x128xi32>
    %cst_15 = arith.constant dense<2147483647> : vector<128xi32>
    %51 = vector.multi_reduction <minsi>, %50, %cst_15 [0] : vector<8x128xi32> to vector<128xi32>
    %52 = vector.shape_cast %51 : vector<128xi32> to vector<1x128xi32>
    %cst_16 = arith.constant dense<0xFF800000> : vector<8xf32>
    %53 = vector.multi_reduction <maximumf>, %42, %cst_16 [1] : vector<8x128xf32> to vector<8xf32>
    %54 = vector.shape_cast %53 : vector<8xf32> to vector<8x1xf32>
    %55 = vector.broadcast %54 : vector<8x1xf32> to vector<8x128xf32>
    %56 = arith.cmpf oeq, %42, %55 : vector<8x128xf32>
    %c128_i32 = arith.constant 128 : i32
    %57 = vector.broadcast %c128_i32 : i32 to vector<8x128xi32>
    %58 = arith.select %56, %44, %57 : vector<8x128xi1>, vector<8x128xi32>
    %cst_17 = arith.constant dense<2147483647> : vector<8xi32>
    %59 = vector.multi_reduction <minsi>, %58, %cst_17 [1] : vector<8x128xi32> to vector<8xi32>
    %60 = vector.shape_cast %59 : vector<8xi32> to vector<8x1xi32>
    %61 = vector.broadcast %60 : vector<8x1xi32> to vector<8x128xi32>
    %62 = arith.cmpi eq, %61, %44 : vector<8x128xi32>
    %c-1_i32 = arith.constant -1 : i32
    %63 = vector.broadcast %c-1_i32 : i32 to vector<8x128xi32>
    %64 = arith.select %62, %43, %63 : vector<8x128xi1>, vector<8x128xi32>
    %cst_18 = arith.constant dense<-2147483648> : vector<128xi32>
    %65 = vector.multi_reduction <maxsi>, %64, %cst_18 [0] : vector<8x128xi32> to vector<128xi32>
    %66 = vector.shape_cast %65 : vector<128xi32> to vector<1x128xi32>
    %c0_i32 = arith.constant 0 : i32
    %67 = vector.broadcast %c0_i32 : i32 to vector<1x128xi32>
    %68 = arith.cmpi sge, %66, %67 : vector<1x128xi32>
    %69 = arith.select %68, %66, %52 : vector<1x128xi1>, vector<1x128xi32>
    %cst_19 = arith.constant 1.000000e+00 : f32
    %70 = vector.broadcast %cst_19 : f32 to vector<1x128xf32>
    %71 = arith.select %68, %70, %46 : vector<1x128xi1>, vector<1x128xf32>
    %72 = vector.broadcast %69 : vector<1x128xi32> to vector<8x128xi32>
    %73 = arith.cmpi eq, %43, %72 : vector<8x128xi32>
    %74 = arith.extui %73 : vector<8x128xi1> to vector<8x128xi32>
    %75 = arith.sitofp %74 : vector<8x128xi32> to vector<8x128xf32>
    %c0_20 = arith.constant 0 : index
    %c0_21 = arith.constant 0 : index
    %76 = vector.load %arg1[%c0_20, %c0_21] : memref<8x8xf32, #tpu.memory_space<vmem>>, vector<8x8xf32>
    %cst_22 = arith.constant dense<0.000000e+00> : vector<8x128xf32>
    %77 = tpu.matmul %76, %75, %cst_22 {dimension_numbers = #tpu.dot_dimension_numbers<[1], [0], [0], [1], [0, 0, 1, 1], [], []>} : vector<8x8xf32>, vector<8x128xf32>, vector<8x128xf32> -> vector<8x128xf32>
    %78 = vector.extract_strided_slice %77 {offsets = [0, 0], sizes = [4, 128], strides = [1, 1]} : vector<8x128xf32> to vector<4x128xf32>
    %79 = vector.extract_strided_slice %77 {offsets = [4, 0], sizes = [1, 128], strides = [1, 1]} : vector<8x128xf32> to vector<1x128xf32>
    %cst_23 = arith.constant 5.000000e-01 : f32
    %80 = vector.broadcast %cst_23 : f32 to vector<1x128xf32>
    %81 = arith.cmpf olt, %71, %80 : vector<1x128xf32>
    %cst_24 = arith.constant 0.000000e+00 : f32
    %82 = vector.broadcast %cst_24 : f32 to vector<1x128xf32>
    %83 = arith.select %81, %82, %79 : vector<1x128xi1>, vector<1x128xf32>
    %cst_25 = arith.constant 0.000000e+00 : f32
    %84 = vector.broadcast %cst_25 : f32 to vector<1x128xf32>
    %85 = arith.cmpf one, %83, %84 : vector<1x128xf32>
    %86 = arith.extui %85 : vector<1x128xi1> to vector<1x128xi32>
    %87 = arith.sitofp %86 : vector<1x128xi32> to vector<1x128xf32>
    %cst_26 = arith.constant 1.000000e+00 : f32
    %88 = vector.broadcast %cst_26 : f32 to vector<1x128xf32>
    %89 = arith.subf %88, %87 : vector<1x128xf32>
    %90 = vector.shape_cast %87 : vector<1x128xf32> to vector<1x1x128xf32>
    %cst_27 = arith.constant dense<0.000000e+00> : vector<1xf32>
    %91 = vector.multi_reduction <add>, %90, %cst_27 [1, 2] : vector<1x1x128xf32> to vector<1xf32>
    %92 = vector.shape_cast %91 : vector<1xf32> to vector<1x1x1xf32>
    %93 = vector.extract %92[0, 0, 0] : f32 from vector<1x1x1xf32>
    %94 = vector.broadcast %93 : f32 to vector<1x1xf32>
    %95 = tpu.reciprocal %94 {approx = true} : vector<1x1xf32> -> vector<1x1xf32>
    %96 = arith.mulf %94, %95 : vector<1x1xf32>
    %cst_28 = arith.constant 2.000000e+00 : f32
    %97 = vector.broadcast %cst_28 : f32 to vector<1x1xf32>
    %98 = arith.subf %97, %96 : vector<1x1xf32>
    %99 = arith.mulf %95, %98 : vector<1x1xf32>
    %c0_29 = arith.constant 0 : index
    %c0_30 = arith.constant 0 : index
    %100 = vector.load %arg2[%c0_29, %c0_30] : memref<4x128xf32, #tpu.memory_space<vmem>>, vector<4x128xf32>
    %101 = arith.subf %100, %78 : vector<4x128xf32>
    %102 = math.absf %101 : vector<4x128xf32>
    %cst_31 = arith.constant dense<0.000000e+00> : vector<128xf32>
    %103 = vector.multi_reduction <add>, %102, %cst_31 [0] : vector<4x128xf32> to vector<128xf32>
    %104 = vector.shape_cast %103 : vector<128xf32> to vector<1x128xf32>
    %105 = arith.mulf %104, %87 : vector<1x128xf32>
    %106 = vector.shape_cast %105 : vector<1x128xf32> to vector<1x1x128xf32>
    %cst_32 = arith.constant dense<0.000000e+00> : vector<1xf32>
    %107 = vector.multi_reduction <add>, %106, %cst_32 [1, 2] : vector<1x1x128xf32> to vector<1xf32>
    %108 = vector.shape_cast %107 : vector<1xf32> to vector<1x1x1xf32>
    %109 = vector.extract %108[0, 0, 0] : f32 from vector<1x1x1xf32>
    %110 = vector.broadcast %109 : f32 to vector<1x1xf32>
    %cst_33 = arith.constant 2.500000e-01 : f32
    %111 = vector.broadcast %cst_33 : f32 to vector<1x1xf32>
    %112 = arith.mulf %111, %99 : vector<1x1xf32>
    %113 = arith.mulf %110, %112 : vector<1x1xf32>
    %c0_34 = arith.constant 0 : index
    %c0_35 = arith.constant 0 : index
    %114 = vector.load %arg3[%c0_34, %c0_35] : memref<1x128xf32, #tpu.memory_space<vmem>>, vector<1x128xf32>
    %cst_36 = arith.constant 1.000000e+00 : f32
    %115 = vector.broadcast %cst_36 : f32 to vector<1x128xf32>
    %116 = arith.subf %115, %114 : vector<1x128xf32>
    %117 = arith.mulf %116, %87 : vector<1x128xf32>
    %118 = vector.shape_cast %117 : vector<1x128xf32> to vector<1x1x128xf32>
    %cst_37 = arith.constant dense<0.000000e+00> : vector<1xf32>
    %119 = vector.multi_reduction <add>, %118, %cst_37 [1, 2] : vector<1x1x128xf32> to vector<1xf32>
    %120 = vector.shape_cast %119 : vector<1xf32> to vector<1x1x1xf32>
    %121 = vector.extract %120[0, 0, 0] : f32 from vector<1x1x1xf32>
    %122 = vector.broadcast %121 : f32 to vector<1x1xf32>
    %123 = arith.mulf %116, %89 : vector<1x128xf32>
    %cst_38 = arith.constant 3.000000e+00 : f32
    %124 = vector.broadcast %cst_38 : f32 to vector<1x1xf32>
    %125 = arith.mulf %124, %94 : vector<1x1xf32>
    %126 = tpu.bitcast %123 : vector<1x128xf32> -> vector<1x128xi32>
    %c0_i32_39 = arith.constant 0 : i32
    %127 = vector.broadcast %c0_i32_39 : i32 to vector<1x1xi32>
    %c1073741824_i32 = arith.constant 1073741824 : i32
    %128 = vector.broadcast %c1073741824_i32 : i32 to vector<1x1xi32>
    %129 = arith.ori %127, %128 : vector<1x1xi32>
    %130 = vector.broadcast %129 : vector<1x1xi32> to vector<1x128xi32>
    %131 = arith.cmpi sge, %126, %130 : vector<1x128xi32>
    %132 = arith.extui %131 : vector<1x128xi1> to vector<1x128xi32>
    %133 = arith.sitofp %132 : vector<1x128xi32> to vector<1x128xf32>
    %cst_40 = arith.constant dense<0.000000e+00> : vector<1xf32>
    %134 = vector.multi_reduction <add>, %133, %cst_40 [1] : vector<1x128xf32> to vector<1xf32>
    %135 = vector.shape_cast %134 : vector<1xf32> to vector<1x1xf32>
    %136 = arith.cmpf oge, %135, %125 : vector<1x1xf32>
    %137 = arith.select %136, %129, %127 : vector<1x1xi1>, vector<1x1xi32>
    %c536870912_i32 = arith.constant 536870912 : i32
    %138 = vector.broadcast %c536870912_i32 : i32 to vector<1x1xi32>
    %139 = arith.ori %137, %138 : vector<1x1xi32>
    %140 = vector.broadcast %139 : vector<1x1xi32> to vector<1x128xi32>
    %141 = arith.cmpi sge, %126, %140 : vector<1x128xi32>
    %142 = arith.extui %141 : vector<1x128xi1> to vector<1x128xi32>
    %143 = arith.sitofp %142 : vector<1x128xi32> to vector<1x128xf32>
    %cst_41 = arith.constant dense<0.000000e+00> : vector<1xf32>
    %144 = vector.multi_reduction <add>, %143, %cst_41 [1] : vector<1x128xf32> to vector<1xf32>
    %145 = vector.shape_cast %144 : vector<1xf32> to vector<1x1xf32>
    %146 = arith.cmpf oge, %145, %125 : vector<1x1xf32>
    %147 = arith.select %146, %139, %137 : vector<1x1xi1>, vector<1x1xi32>
    %c268435456_i32 = arith.constant 268435456 : i32
    %148 = vector.broadcast %c268435456_i32 : i32 to vector<1x1xi32>
    %149 = arith.ori %147, %148 : vector<1x1xi32>
    %150 = vector.broadcast %149 : vector<1x1xi32> to vector<1x128xi32>
    %151 = arith.cmpi sge, %126, %150 : vector<1x128xi32>
    %152 = arith.extui %151 : vector<1x128xi1> to vector<1x128xi32>
    %153 = arith.sitofp %152 : vector<1x128xi32> to vector<1x128xf32>
    %cst_42 = arith.constant dense<0.000000e+00> : vector<1xf32>
    %154 = vector.multi_reduction <add>, %153, %cst_42 [1] : vector<1x128xf32> to vector<1xf32>
    %155 = vector.shape_cast %154 : vector<1xf32> to vector<1x1xf32>
    %156 = arith.cmpf oge, %155, %125 : vector<1x1xf32>
    %157 = arith.select %156, %149, %147 : vector<1x1xi1>, vector<1x1xi32>
    %c134217728_i32 = arith.constant 134217728 : i32
    %158 = vector.broadcast %c134217728_i32 : i32 to vector<1x1xi32>
    %159 = arith.ori %157, %158 : vector<1x1xi32>
    %160 = vector.broadcast %159 : vector<1x1xi32> to vector<1x128xi32>
    %161 = arith.cmpi sge, %126, %160 : vector<1x128xi32>
    %162 = arith.extui %161 : vector<1x128xi1> to vector<1x128xi32>
    %163 = arith.sitofp %162 : vector<1x128xi32> to vector<1x128xf32>
    %cst_43 = arith.constant dense<0.000000e+00> : vector<1xf32>
    %164 = vector.multi_reduction <add>, %163, %cst_43 [1] : vector<1x128xf32> to vector<1xf32>
    %165 = vector.shape_cast %164 : vector<1xf32> to vector<1x1xf32>
    %166 = arith.cmpf oge, %165, %125 : vector<1x1xf32>
    %167 = arith.select %166, %159, %157 : vector<1x1xi1>, vector<1x1xi32>
    %c67108864_i32 = arith.constant 67108864 : i32
    %168 = vector.broadcast %c67108864_i32 : i32 to vector<1x1xi32>
    %169 = arith.ori %167, %168 : vector<1x1xi32>
    %170 = vector.broadcast %169 : vector<1x1xi32> to vector<1x128xi32>
    %171 = arith.cmpi sge, %126, %170 : vector<1x128xi32>
    %172 = arith.extui %171 : vector<1x128xi1> to vector<1x128xi32>
    %173 = arith.sitofp %172 : vector<1x128xi32> to vector<1x128xf32>
    %cst_44 = arith.constant dense<0.000000e+00> : vector<1xf32>
    %174 = vector.multi_reduction <add>, %173, %cst_44 [1] : vector<1x128xf32> to vector<1xf32>
    %175 = vector.shape_cast %174 : vector<1xf32> to vector<1x1xf32>
    %176 = arith.cmpf oge, %175, %125 : vector<1x1xf32>
    %177 = arith.select %176, %169, %167 : vector<1x1xi1>, vector<1x1xi32>
    %c33554432_i32 = arith.constant 33554432 : i32
    %178 = vector.broadcast %c33554432_i32 : i32 to vector<1x1xi32>
    %179 = arith.ori %177, %178 : vector<1x1xi32>
    %180 = vector.broadcast %179 : vector<1x1xi32> to vector<1x128xi32>
    %181 = arith.cmpi sge, %126, %180 : vector<1x128xi32>
    %182 = arith.extui %181 : vector<1x128xi1> to vector<1x128xi32>
    %183 = arith.sitofp %182 : vector<1x128xi32> to vector<1x128xf32>
    %cst_45 = arith.constant dense<0.000000e+00> : vector<1xf32>
    %184 = vector.multi_reduction <add>, %183, %cst_45 [1] : vector<1x128xf32> to vector<1xf32>
    %185 = vector.shape_cast %184 : vector<1xf32> to vector<1x1xf32>
    %186 = arith.cmpf oge, %185, %125 : vector<1x1xf32>
    %187 = arith.select %186, %179, %177 : vector<1x1xi1>, vector<1x1xi32>
    %c16777216_i32 = arith.constant 16777216 : i32
    %188 = vector.broadcast %c16777216_i32 : i32 to vector<1x1xi32>
    %189 = arith.ori %187, %188 : vector<1x1xi32>
    %190 = vector.broadcast %189 : vector<1x1xi32> to vector<1x128xi32>
    %191 = arith.cmpi sge, %126, %190 : vector<1x128xi32>
    %192 = arith.extui %191 : vector<1x128xi1> to vector<1x128xi32>
    %193 = arith.sitofp %192 : vector<1x128xi32> to vector<1x128xf32>
    %cst_46 = arith.constant dense<0.000000e+00> : vector<1xf32>
    %194 = vector.multi_reduction <add>, %193, %cst_46 [1] : vector<1x128xf32> to vector<1xf32>
    %195 = vector.shape_cast %194 : vector<1xf32> to vector<1x1xf32>
    %196 = arith.cmpf oge, %195, %125 : vector<1x1xf32>
    %197 = arith.select %196, %189, %187 : vector<1x1xi1>, vector<1x1xi32>
    %c8388608_i32 = arith.constant 8388608 : i32
    %198 = vector.broadcast %c8388608_i32 : i32 to vector<1x1xi32>
    %199 = arith.ori %197, %198 : vector<1x1xi32>
    %200 = vector.broadcast %199 : vector<1x1xi32> to vector<1x128xi32>
    %201 = arith.cmpi sge, %126, %200 : vector<1x128xi32>
    %202 = arith.extui %201 : vector<1x128xi1> to vector<1x128xi32>
    %203 = arith.sitofp %202 : vector<1x128xi32> to vector<1x128xf32>
    %cst_47 = arith.constant dense<0.000000e+00> : vector<1xf32>
    %204 = vector.multi_reduction <add>, %203, %cst_47 [1] : vector<1x128xf32> to vector<1xf32>
    %205 = vector.shape_cast %204 : vector<1xf32> to vector<1x1xf32>
    %206 = arith.cmpf oge, %205, %125 : vector<1x1xf32>
    %207 = arith.select %206, %199, %197 : vector<1x1xi1>, vector<1x1xi32>
    %c4194304_i32 = arith.constant 4194304 : i32
    %208 = vector.broadcast %c4194304_i32 : i32 to vector<1x1xi32>
    %209 = arith.ori %207, %208 : vector<1x1xi32>
    %210 = vector.broadcast %209 : vector<1x1xi32> to vector<1x128xi32>
    %211 = arith.cmpi sge, %126, %210 : vector<1x128xi32>
    %212 = arith.extui %211 : vector<1x128xi1> to vector<1x128xi32>
    %213 = arith.sitofp %212 : vector<1x128xi32> to vector<1x128xf32>
    %cst_48 = arith.constant dense<0.000000e+00> : vector<1xf32>
    %214 = vector.multi_reduction <add>, %213, %cst_48 [1] : vector<1x128xf32> to vector<1xf32>
    %215 = vector.shape_cast %214 : vector<1xf32> to vector<1x1xf32>
    %216 = arith.cmpf oge, %215, %125 : vector<1x1xf32>
    %217 = arith.select %216, %209, %207 : vector<1x1xi1>, vector<1x1xi32>
    %c2097152_i32 = arith.constant 2097152 : i32
    %218 = vector.broadcast %c2097152_i32 : i32 to vector<1x1xi32>
    %219 = arith.ori %217, %218 : vector<1x1xi32>
    %220 = vector.broadcast %219 : vector<1x1xi32> to vector<1x128xi32>
    %221 = arith.cmpi sge, %126, %220 : vector<1x128xi32>
    %222 = arith.extui %221 : vector<1x128xi1> to vector<1x128xi32>
    %223 = arith.sitofp %222 : vector<1x128xi32> to vector<1x128xf32>
    %cst_49 = arith.constant dense<0.000000e+00> : vector<1xf32>
    %224 = vector.multi_reduction <add>, %223, %cst_49 [1] : vector<1x128xf32> to vector<1xf32>
    %225 = vector.shape_cast %224 : vector<1xf32> to vector<1x1xf32>
    %226 = arith.cmpf oge, %225, %125 : vector<1x1xf32>
    %227 = arith.select %226, %219, %217 : vector<1x1xi1>, vector<1x1xi32>
    %c1048576_i32 = arith.constant 1048576 : i32
    %228 = vector.broadcast %c1048576_i32 : i32 to vector<1x1xi32>
    %229 = arith.ori %227, %228 : vector<1x1xi32>
    %230 = vector.broadcast %229 : vector<1x1xi32> to vector<1x128xi32>
    %231 = arith.cmpi sge, %126, %230 : vector<1x128xi32>
    %232 = arith.extui %231 : vector<1x128xi1> to vector<1x128xi32>
    %233 = arith.sitofp %232 : vector<1x128xi32> to vector<1x128xf32>
    %cst_50 = arith.constant dense<0.000000e+00> : vector<1xf32>
    %234 = vector.multi_reduction <add>, %233, %cst_50 [1] : vector<1x128xf32> to vector<1xf32>
    %235 = vector.shape_cast %234 : vector<1xf32> to vector<1x1xf32>
    %236 = arith.cmpf oge, %235, %125 : vector<1x1xf32>
    %237 = arith.select %236, %229, %227 : vector<1x1xi1>, vector<1x1xi32>
    %c524288_i32 = arith.constant 524288 : i32
    %238 = vector.broadcast %c524288_i32 : i32 to vector<1x1xi32>
    %239 = arith.ori %237, %238 : vector<1x1xi32>
    %240 = vector.broadcast %239 : vector<1x1xi32> to vector<1x128xi32>
    %241 = arith.cmpi sge, %126, %240 : vector<1x128xi32>
    %242 = arith.extui %241 : vector<1x128xi1> to vector<1x128xi32>
    %243 = arith.sitofp %242 : vector<1x128xi32> to vector<1x128xf32>
    %cst_51 = arith.constant dense<0.000000e+00> : vector<1xf32>
    %244 = vector.multi_reduction <add>, %243, %cst_51 [1] : vector<1x128xf32> to vector<1xf32>
    %245 = vector.shape_cast %244 : vector<1xf32> to vector<1x1xf32>
    %246 = arith.cmpf oge, %245, %125 : vector<1x1xf32>
    %247 = arith.select %246, %239, %237 : vector<1x1xi1>, vector<1x1xi32>
    %c262144_i32 = arith.constant 262144 : i32
    %248 = vector.broadcast %c262144_i32 : i32 to vector<1x1xi32>
    %249 = arith.ori %247, %248 : vector<1x1xi32>
    %250 = vector.broadcast %249 : vector<1x1xi32> to vector<1x128xi32>
    %251 = arith.cmpi sge, %126, %250 : vector<1x128xi32>
    %252 = arith.extui %251 : vector<1x128xi1> to vector<1x128xi32>
    %253 = arith.sitofp %252 : vector<1x128xi32> to vector<1x128xf32>
    %cst_52 = arith.constant dense<0.000000e+00> : vector<1xf32>
    %254 = vector.multi_reduction <add>, %253, %cst_52 [1] : vector<1x128xf32> to vector<1xf32>
    %255 = vector.shape_cast %254 : vector<1xf32> to vector<1x1xf32>
    %256 = arith.cmpf oge, %255, %125 : vector<1x1xf32>
    %257 = arith.select %256, %249, %247 : vector<1x1xi1>, vector<1x1xi32>
    %c131072_i32 = arith.constant 131072 : i32
    %258 = vector.broadcast %c131072_i32 : i32 to vector<1x1xi32>
    %259 = arith.ori %257, %258 : vector<1x1xi32>
    %260 = vector.broadcast %259 : vector<1x1xi32> to vector<1x128xi32>
    %261 = arith.cmpi sge, %126, %260 : vector<1x128xi32>
    %262 = arith.extui %261 : vector<1x128xi1> to vector<1x128xi32>
    %263 = arith.sitofp %262 : vector<1x128xi32> to vector<1x128xf32>
    %cst_53 = arith.constant dense<0.000000e+00> : vector<1xf32>
    %264 = vector.multi_reduction <add>, %263, %cst_53 [1] : vector<1x128xf32> to vector<1xf32>
    %265 = vector.shape_cast %264 : vector<1xf32> to vector<1x1xf32>
    %266 = arith.cmpf oge, %265, %125 : vector<1x1xf32>
    %267 = arith.select %266, %259, %257 : vector<1x1xi1>, vector<1x1xi32>
    %c65536_i32 = arith.constant 65536 : i32
    %268 = vector.broadcast %c65536_i32 : i32 to vector<1x1xi32>
    %269 = arith.ori %267, %268 : vector<1x1xi32>
    %270 = vector.broadcast %269 : vector<1x1xi32> to vector<1x128xi32>
    %271 = arith.cmpi sge, %126, %270 : vector<1x128xi32>
    %272 = arith.extui %271 : vector<1x128xi1> to vector<1x128xi32>
    %273 = arith.sitofp %272 : vector<1x128xi32> to vector<1x128xf32>
    %cst_54 = arith.constant dense<0.000000e+00> : vector<1xf32>
    %274 = vector.multi_reduction <add>, %273, %cst_54 [1] : vector<1x128xf32> to vector<1xf32>
    %275 = vector.shape_cast %274 : vector<1xf32> to vector<1x1xf32>
    %276 = arith.cmpf oge, %275, %125 : vector<1x1xf32>
    %277 = arith.select %276, %269, %267 : vector<1x1xi1>, vector<1x1xi32>
    %c32768_i32 = arith.constant 32768 : i32
    %278 = vector.broadcast %c32768_i32 : i32 to vector<1x1xi32>
    %279 = arith.ori %277, %278 : vector<1x1xi32>
    %280 = vector.broadcast %279 : vector<1x1xi32> to vector<1x128xi32>
    %281 = arith.cmpi sge, %126, %280 : vector<1x128xi32>
    %282 = arith.extui %281 : vector<1x128xi1> to vector<1x128xi32>
    %283 = arith.sitofp %282 : vector<1x128xi32> to vector<1x128xf32>
    %cst_55 = arith.constant dense<0.000000e+00> : vector<1xf32>
    %284 = vector.multi_reduction <add>, %283, %cst_55 [1] : vector<1x128xf32> to vector<1xf32>
    %285 = vector.shape_cast %284 : vector<1xf32> to vector<1x1xf32>
    %286 = arith.cmpf oge, %285, %125 : vector<1x1xf32>
    %287 = arith.select %286, %279, %277 : vector<1x1xi1>, vector<1x1xi32>
    %c16384_i32 = arith.constant 16384 : i32
    %288 = vector.broadcast %c16384_i32 : i32 to vector<1x1xi32>
    %289 = arith.ori %287, %288 : vector<1x1xi32>
    %290 = vector.broadcast %289 : vector<1x1xi32> to vector<1x128xi32>
    %291 = arith.cmpi sge, %126, %290 : vector<1x128xi32>
    %292 = arith.extui %291 : vector<1x128xi1> to vector<1x128xi32>
    %293 = arith.sitofp %292 : vector<1x128xi32> to vector<1x128xf32>
    %cst_56 = arith.constant dense<0.000000e+00> : vector<1xf32>
    %294 = vector.multi_reduction <add>, %293, %cst_56 [1] : vector<1x128xf32> to vector<1xf32>
    %295 = vector.shape_cast %294 : vector<1xf32> to vector<1x1xf32>
    %296 = arith.cmpf oge, %295, %125 : vector<1x1xf32>
    %297 = arith.select %296, %289, %287 : vector<1x1xi1>, vector<1x1xi32>
    %c8192_i32 = arith.constant 8192 : i32
    %298 = vector.broadcast %c8192_i32 : i32 to vector<1x1xi32>
    %299 = arith.ori %297, %298 : vector<1x1xi32>
    %300 = vector.broadcast %299 : vector<1x1xi32> to vector<1x128xi32>
    %301 = arith.cmpi sge, %126, %300 : vector<1x128xi32>
    %302 = arith.extui %301 : vector<1x128xi1> to vector<1x128xi32>
    %303 = arith.sitofp %302 : vector<1x128xi32> to vector<1x128xf32>
    %cst_57 = arith.constant dense<0.000000e+00> : vector<1xf32>
    %304 = vector.multi_reduction <add>, %303, %cst_57 [1] : vector<1x128xf32> to vector<1xf32>
    %305 = vector.shape_cast %304 : vector<1xf32> to vector<1x1xf32>
    %306 = arith.cmpf oge, %305, %125 : vector<1x1xf32>
    %307 = arith.select %306, %299, %297 : vector<1x1xi1>, vector<1x1xi32>
    %c4096_i32 = arith.constant 4096 : i32
    %308 = vector.broadcast %c4096_i32 : i32 to vector<1x1xi32>
    %309 = arith.ori %307, %308 : vector<1x1xi32>
    %310 = vector.broadcast %309 : vector<1x1xi32> to vector<1x128xi32>
    %311 = arith.cmpi sge, %126, %310 : vector<1x128xi32>
    %312 = arith.extui %311 : vector<1x128xi1> to vector<1x128xi32>
    %313 = arith.sitofp %312 : vector<1x128xi32> to vector<1x128xf32>
    %cst_58 = arith.constant dense<0.000000e+00> : vector<1xf32>
    %314 = vector.multi_reduction <add>, %313, %cst_58 [1] : vector<1x128xf32> to vector<1xf32>
    %315 = vector.shape_cast %314 : vector<1xf32> to vector<1x1xf32>
    %316 = arith.cmpf oge, %315, %125 : vector<1x1xf32>
    %317 = arith.select %316, %309, %307 : vector<1x1xi1>, vector<1x1xi32>
    %c2048_i32 = arith.constant 2048 : i32
    %318 = vector.broadcast %c2048_i32 : i32 to vector<1x1xi32>
    %319 = arith.ori %317, %318 : vector<1x1xi32>
    %320 = vector.broadcast %319 : vector<1x1xi32> to vector<1x128xi32>
    %321 = arith.cmpi sge, %126, %320 : vector<1x128xi32>
    %322 = arith.extui %321 : vector<1x128xi1> to vector<1x128xi32>
    %323 = arith.sitofp %322 : vector<1x128xi32> to vector<1x128xf32>
    %cst_59 = arith.constant dense<0.000000e+00> : vector<1xf32>
    %324 = vector.multi_reduction <add>, %323, %cst_59 [1] : vector<1x128xf32> to vector<1xf32>
    %325 = vector.shape_cast %324 : vector<1xf32> to vector<1x1xf32>
    %326 = arith.cmpf oge, %325, %125 : vector<1x1xf32>
    %327 = arith.select %326, %319, %317 : vector<1x1xi1>, vector<1x1xi32>
    %c1024_i32 = arith.constant 1024 : i32
    %328 = vector.broadcast %c1024_i32 : i32 to vector<1x1xi32>
    %329 = arith.ori %327, %328 : vector<1x1xi32>
    %330 = vector.broadcast %329 : vector<1x1xi32> to vector<1x128xi32>
    %331 = arith.cmpi sge, %126, %330 : vector<1x128xi32>
    %332 = arith.extui %331 : vector<1x128xi1> to vector<1x128xi32>
    %333 = arith.sitofp %332 : vector<1x128xi32> to vector<1x128xf32>
    %cst_60 = arith.constant dense<0.000000e+00> : vector<1xf32>
    %334 = vector.multi_reduction <add>, %333, %cst_60 [1] : vector<1x128xf32> to vector<1xf32>
    %335 = vector.shape_cast %334 : vector<1xf32> to vector<1x1xf32>
    %336 = arith.cmpf oge, %335, %125 : vector<1x1xf32>
    %337 = arith.select %336, %329, %327 : vector<1x1xi1>, vector<1x1xi32>
    %c512_i32 = arith.constant 512 : i32
    %338 = vector.broadcast %c512_i32 : i32 to vector<1x1xi32>
    %339 = arith.ori %337, %338 : vector<1x1xi32>
    %340 = vector.broadcast %339 : vector<1x1xi32> to vector<1x128xi32>
    %341 = arith.cmpi sge, %126, %340 : vector<1x128xi32>
    %342 = arith.extui %341 : vector<1x128xi1> to vector<1x128xi32>
    %343 = arith.sitofp %342 : vector<1x128xi32> to vector<1x128xf32>
    %cst_61 = arith.constant dense<0.000000e+00> : vector<1xf32>
    %344 = vector.multi_reduction <add>, %343, %cst_61 [1] : vector<1x128xf32> to vector<1xf32>
    %345 = vector.shape_cast %344 : vector<1xf32> to vector<1x1xf32>
    %346 = arith.cmpf oge, %345, %125 : vector<1x1xf32>
    %347 = arith.select %346, %339, %337 : vector<1x1xi1>, vector<1x1xi32>
    %c256_i32 = arith.constant 256 : i32
    %348 = vector.broadcast %c256_i32 : i32 to vector<1x1xi32>
    %349 = arith.ori %347, %348 : vector<1x1xi32>
    %350 = vector.broadcast %349 : vector<1x1xi32> to vector<1x128xi32>
    %351 = arith.cmpi sge, %126, %350 : vector<1x128xi32>
    %352 = arith.extui %351 : vector<1x128xi1> to vector<1x128xi32>
    %353 = arith.sitofp %352 : vector<1x128xi32> to vector<1x128xf32>
    %cst_62 = arith.constant dense<0.000000e+00> : vector<1xf32>
    %354 = vector.multi_reduction <add>, %353, %cst_62 [1] : vector<1x128xf32> to vector<1xf32>
    %355 = vector.shape_cast %354 : vector<1xf32> to vector<1x1xf32>
    %356 = arith.cmpf oge, %355, %125 : vector<1x1xf32>
    %357 = arith.select %356, %349, %347 : vector<1x1xi1>, vector<1x1xi32>
    %c128_i32_63 = arith.constant 128 : i32
    %358 = vector.broadcast %c128_i32_63 : i32 to vector<1x1xi32>
    %359 = arith.ori %357, %358 : vector<1x1xi32>
    %360 = vector.broadcast %359 : vector<1x1xi32> to vector<1x128xi32>
    %361 = arith.cmpi sge, %126, %360 : vector<1x128xi32>
    %362 = arith.extui %361 : vector<1x128xi1> to vector<1x128xi32>
    %363 = arith.sitofp %362 : vector<1x128xi32> to vector<1x128xf32>
    %cst_64 = arith.constant dense<0.000000e+00> : vector<1xf32>
    %364 = vector.multi_reduction <add>, %363, %cst_64 [1] : vector<1x128xf32> to vector<1xf32>
    %365 = vector.shape_cast %364 : vector<1xf32> to vector<1x1xf32>
    %366 = arith.cmpf oge, %365, %125 : vector<1x1xf32>
    %367 = arith.select %366, %359, %357 : vector<1x1xi1>, vector<1x1xi32>
    %c64_i32 = arith.constant 64 : i32
    %368 = vector.broadcast %c64_i32 : i32 to vector<1x1xi32>
    %369 = arith.ori %367, %368 : vector<1x1xi32>
    %370 = vector.broadcast %369 : vector<1x1xi32> to vector<1x128xi32>
    %371 = arith.cmpi sge, %126, %370 : vector<1x128xi32>
    %372 = arith.extui %371 : vector<1x128xi1> to vector<1x128xi32>
    %373 = arith.sitofp %372 : vector<1x128xi32> to vector<1x128xf32>
    %cst_65 = arith.constant dense<0.000000e+00> : vector<1xf32>
    %374 = vector.multi_reduction <add>, %373, %cst_65 [1] : vector<1x128xf32> to vector<1xf32>
    %375 = vector.shape_cast %374 : vector<1xf32> to vector<1x1xf32>
    %376 = arith.cmpf oge, %375, %125 : vector<1x1xf32>
    %377 = arith.select %376, %369, %367 : vector<1x1xi1>, vector<1x1xi32>
    %c32_i32 = arith.constant 32 : i32
    %378 = vector.broadcast %c32_i32 : i32 to vector<1x1xi32>
    %379 = arith.ori %377, %378 : vector<1x1xi32>
    %380 = vector.broadcast %379 : vector<1x1xi32> to vector<1x128xi32>
    %381 = arith.cmpi sge, %126, %380 : vector<1x128xi32>
    %382 = arith.extui %381 : vector<1x128xi1> to vector<1x128xi32>
    %383 = arith.sitofp %382 : vector<1x128xi32> to vector<1x128xf32>
    %cst_66 = arith.constant dense<0.000000e+00> : vector<1xf32>
    %384 = vector.multi_reduction <add>, %383, %cst_66 [1] : vector<1x128xf32> to vector<1xf32>
    %385 = vector.shape_cast %384 : vector<1xf32> to vector<1x1xf32>
    %386 = arith.cmpf oge, %385, %125 : vector<1x1xf32>
    %387 = arith.select %386, %379, %377 : vector<1x1xi1>, vector<1x1xi32>
    %c16_i32 = arith.constant 16 : i32
    %388 = vector.broadcast %c16_i32 : i32 to vector<1x1xi32>
    %389 = arith.ori %387, %388 : vector<1x1xi32>
    %390 = vector.broadcast %389 : vector<1x1xi32> to vector<1x128xi32>
    %391 = arith.cmpi sge, %126, %390 : vector<1x128xi32>
    %392 = arith.extui %391 : vector<1x128xi1> to vector<1x128xi32>
    %393 = arith.sitofp %392 : vector<1x128xi32> to vector<1x128xf32>
    %cst_67 = arith.constant dense<0.000000e+00> : vector<1xf32>
    %394 = vector.multi_reduction <add>, %393, %cst_67 [1] : vector<1x128xf32> to vector<1xf32>
    %395 = vector.shape_cast %394 : vector<1xf32> to vector<1x1xf32>
    %396 = arith.cmpf oge, %395, %125 : vector<1x1xf32>
    %397 = arith.select %396, %389, %387 : vector<1x1xi1>, vector<1x1xi32>
    %c8_i32_68 = arith.constant 8 : i32
    %398 = vector.broadcast %c8_i32_68 : i32 to vector<1x1xi32>
    %399 = arith.ori %397, %398 : vector<1x1xi32>
    %400 = vector.broadcast %399 : vector<1x1xi32> to vector<1x128xi32>
    %401 = arith.cmpi sge, %126, %400 : vector<1x128xi32>
    %402 = arith.extui %401 : vector<1x128xi1> to vector<1x128xi32>
    %403 = arith.sitofp %402 : vector<1x128xi32> to vector<1x128xf32>
    %cst_69 = arith.constant dense<0.000000e+00> : vector<1xf32>
    %404 = vector.multi_reduction <add>, %403, %cst_69 [1] : vector<1x128xf32> to vector<1xf32>
    %405 = vector.shape_cast %404 : vector<1xf32> to vector<1x1xf32>
    %406 = arith.cmpf oge, %405, %125 : vector<1x1xf32>
    %407 = arith.select %406, %399, %397 : vector<1x1xi1>, vector<1x1xi32>
    %c4_i32 = arith.constant 4 : i32
    %408 = vector.broadcast %c4_i32 : i32 to vector<1x1xi32>
    %409 = arith.ori %407, %408 : vector<1x1xi32>
    %410 = vector.broadcast %409 : vector<1x1xi32> to vector<1x128xi32>
    %411 = arith.cmpi sge, %126, %410 : vector<1x128xi32>
    %412 = arith.extui %411 : vector<1x128xi1> to vector<1x128xi32>
    %413 = arith.sitofp %412 : vector<1x128xi32> to vector<1x128xf32>
    %cst_70 = arith.constant dense<0.000000e+00> : vector<1xf32>
    %414 = vector.multi_reduction <add>, %413, %cst_70 [1] : vector<1x128xf32> to vector<1xf32>
    %415 = vector.shape_cast %414 : vector<1xf32> to vector<1x1xf32>
    %416 = arith.cmpf oge, %415, %125 : vector<1x1xf32>
    %417 = arith.select %416, %409, %407 : vector<1x1xi1>, vector<1x1xi32>
    %c2_i32 = arith.constant 2 : i32
    %418 = vector.broadcast %c2_i32 : i32 to vector<1x1xi32>
    %419 = arith.ori %417, %418 : vector<1x1xi32>
    %420 = vector.broadcast %419 : vector<1x1xi32> to vector<1x128xi32>
    %421 = arith.cmpi sge, %126, %420 : vector<1x128xi32>
    %422 = arith.extui %421 : vector<1x128xi1> to vector<1x128xi32>
    %423 = arith.sitofp %422 : vector<1x128xi32> to vector<1x128xf32>
    %cst_71 = arith.constant dense<0.000000e+00> : vector<1xf32>
    %424 = vector.multi_reduction <add>, %423, %cst_71 [1] : vector<1x128xf32> to vector<1xf32>
    %425 = vector.shape_cast %424 : vector<1xf32> to vector<1x1xf32>
    %426 = arith.cmpf oge, %425, %125 : vector<1x1xf32>
    %427 = arith.select %426, %419, %417 : vector<1x1xi1>, vector<1x1xi32>
    %c1_i32 = arith.constant 1 : i32
    %428 = vector.broadcast %c1_i32 : i32 to vector<1x1xi32>
    %429 = arith.ori %427, %428 : vector<1x1xi32>
    %430 = vector.broadcast %429 : vector<1x1xi32> to vector<1x128xi32>
    %431 = arith.cmpi sge, %126, %430 : vector<1x128xi32>
    %432 = arith.extui %431 : vector<1x128xi1> to vector<1x128xi32>
    %433 = arith.sitofp %432 : vector<1x128xi32> to vector<1x128xf32>
    %cst_72 = arith.constant dense<0.000000e+00> : vector<1xf32>
    %434 = vector.multi_reduction <add>, %433, %cst_72 [1] : vector<1x128xf32> to vector<1xf32>
    %435 = vector.shape_cast %434 : vector<1xf32> to vector<1x1xf32>
    %436 = arith.cmpf oge, %435, %125 : vector<1x1xf32>
    %437 = arith.select %436, %429, %427 : vector<1x1xi1>, vector<1x1xi32>
    %438 = tpu.bitcast %437 : vector<1x1xi32> -> vector<1x1xf32>
    %439 = vector.broadcast %438 : vector<1x1xf32> to vector<1x128xf32>
    %440 = arith.cmpf ogt, %123, %439 : vector<1x128xf32>
    %441 = arith.extui %440 : vector<1x128xi1> to vector<1x128xi32>
    %442 = arith.sitofp %441 : vector<1x128xi32> to vector<1x128xf32>
    %443 = vector.shape_cast %442 : vector<1x128xf32> to vector<1x1x128xf32>
    %cst_73 = arith.constant dense<0.000000e+00> : vector<1xf32>
    %444 = vector.multi_reduction <add>, %443, %cst_73 [1, 2] : vector<1x1x128xf32> to vector<1xf32>
    %445 = vector.shape_cast %444 : vector<1xf32> to vector<1x1x1xf32>
    %446 = vector.extract %445[0, 0, 0] : f32 from vector<1x1x1xf32>
    %447 = vector.broadcast %446 : f32 to vector<1x1xf32>
    %cst_74 = arith.constant 0.000000e+00 : f32
    %448 = vector.broadcast %cst_74 : f32 to vector<1x128xf32>
    %449 = arith.select %440, %123, %448 : vector<1x128xi1>, vector<1x128xf32>
    %450 = vector.shape_cast %449 : vector<1x128xf32> to vector<1x1x128xf32>
    %cst_75 = arith.constant dense<0.000000e+00> : vector<1xf32>
    %451 = vector.multi_reduction <add>, %450, %cst_75 [1, 2] : vector<1x1x128xf32> to vector<1xf32>
    %452 = vector.shape_cast %451 : vector<1xf32> to vector<1x1x1xf32>
    %453 = vector.extract %452[0, 0, 0] : f32 from vector<1x1x1xf32>
    %454 = vector.broadcast %453 : f32 to vector<1x1xf32>
    %455 = arith.subf %125, %447 : vector<1x1xf32>
    %456 = arith.mulf %438, %455 : vector<1x1xf32>
    %457 = arith.addf %454, %456 : vector<1x1xf32>
    %458 = arith.addf %457, %122 : vector<1x1xf32>
    %459 = arith.mulf %458, %99 : vector<1x1xf32>
    %cst_76 = arith.constant 1.000000e+00 : f32
    %460 = vector.broadcast %cst_76 : f32 to vector<1x1xf32>
    %461 = arith.mulf %460, %113 : vector<1x1xf32>
    %462 = arith.addf %459, %461 : vector<1x1xf32>
    %c0_77 = arith.constant 0 : index
    %c0_78 = arith.constant 0 : index
    %463 = vector.load %arg4[%c0_77, %c0_78] : memref<1x1xf32, #tpu.memory_space<vmem>>, vector<1x1xf32>
    tpu.vector_store %arg4[%c0_77, %c0_78], %462 {strides = array<i32>} : memref<1x1xf32, #tpu.memory_space<vmem>>, vector<1x1xf32>,
    return
  }
}

</mosaic_0001>

<bundles_post_ra>
// kernel: tpu_custom_call.1
= control target key start
LH: loop header
LB: loop body
LE: loop exit
PB: predicated region body
PF: predicated region fallthrough
CT: control target
= control target key end

     0   :  { %s751_s17 = smov 2   ;;  %v752_v1 = vmov 0   ;;  %s983_s0 = inlined_call_operand.vmem [shape: f32[8,4], index: 0, kind: input, shape index: {}]   ;;  %s984_s1 = inlined_call_operand.vmem [shape: f32[8,8], index: 1, kind: input, shape index: {}]   ;;  %s985_s2 = inlined_call_operand.vmem [shape: f32[4,128], index: 2, kind: input, shape index: {}]   ;;  %s986_s3 = inlined_call_operand.vmem [shape: f32[1,128], index: 3, kind: input, shape index: {}]   ;;  %s987_s4 = inlined_call_operand.hbm [shape: f32[1,1], index: 4, kind: output, shape index: {}]  }
   0x1   :  { %v18_v0 = vld [vmem:[%s983_s0] sm:$0xff]  ;;  %718 = vset.pattern.permute.xlu1 %v752_v1 }
   0x2   :  { %65 = vrot.lane.b32.xlu0 %v18_v0, %s751_s17 }
   0x3   :  { %9 = vsyncpa [#allocation3], 0  ;;  %25 = vperm.xlu1 %718, %v18_v0   ;;  %v753_v2 = vmov 2   ;;  %v754_v3 = vmov 1   ;;  %v755_v4 = vmov 3   ;;  %s756_s18 = smov 127   ;;  %v28_v9 = vlaneseq }
   0x4   :  { %720 = vset.pattern.permute.xlu0 %v753_v2  ;;  %v19_v13 = vld [vmem:[%s985_s2] sm:$0x1]  ;;  %v20_v15 = vld [vmem:[%s985_s2 + $0x1] sm:$0x1]  ;;  %v22_v16 = vld [vmem:[%s985_s2 + $0x3] sm:$0x1] }
   0x5   :  { %v791_v11 = vshrl.u32 %v28_v9, 7  ;;  %v21_v17 = vld [vmem:[%s985_s2 + $0x2] sm:$0x1]  ;;  %v75_v24 = vsub.f32 %v22_v16, %v20_v15  ;;  %v96_v45 = vand.u32 127, %v28_v9  ;;  %v757_v54 = vmov 0.0   ;;  %s761_s8 = smov [#allocation2]  }
   0x6   :  { %v74_v25 = vsub.f32 %v21_v17, %v19_v13  ;;  %692 = vmatprep.subr.mxu0 %v757_v54  ;;  %vm758_vm2 = vmmov 0   ;;  %vm150_vm12 = vcmask 64512   ;;  %s646_s9 = sshll.u32 %s761_s8, 4  ;;  %s647_s9 = int_to_ptr.vmem [resolvable:$true] %s646_s9 }
   0x7   :  { %719 = vset.pattern.permute.xlu1 %v754_v3  ;;  %v30_v14 = vsub.s32 0, %v791_v11  ;;  %694 = vmatprep.mubr.msk.f32.mxu0 %vm758_vm2, %v757_v54  ;;  %s727_s10 = scalar_lea.vmem %s647_s9, 16  ;;  %s731_s11 = scalar_lea.vmem %s647_s9, 32 }
   0x8   :  { %34 = vperm.xlu1 %719, %v18_v0   ;;  %v76_v32 = vmul.f32 %v75_v24, %v74_v25  ;;  %v249_v24 = vld [vmem:[%s985_s2] sm:$0xf]  ;;  %p728_p0 = scmp.ne.s32.totalorder %s647_s9, %s727_s10  ;;  %p732_p1 = scmp.lt.s32.totalorder %s647_s9, %s647_s9 }
   0x9   :  { %v31_v18 = vrot.slane %v19_v13, %v30_v14  ;;  %v40_v19 = vrot.slane %v20_v15, %v30_v14  ;;  %v58_v20 = vrot.slane %v22_v16, %v30_v14  ;;  %v49_v21 = vrot.slane %v21_v17, %v30_v14  ;;  %p733_p2 = scmp.lt.s32.totalorder %s731_s11, %s727_s10 }
   0xa   :  { %v85_v35 = vrot.slane %v76_v32, %v30_v14 }
   0xb   :  { %p734_p3 = por %p733_p2, %p732_p1 }
   0xc   :  { %721 = vset.pattern.permute.xlu1 %v755_v4 }
   0xd   :  { %52 = vperm.xlu1 %721, %v18_v0   ;;  %p735_p4 = pnand %p734_p3, %p728_p0 }
  0x11   :  { %722 = vset.pattern.permute.xlu1 %v753_v2 }
  0x74   :  { %v66_v5 = vpop.permute.xlu0 %65 }
  0x75   :  { %v68_v6 = vsub.f32 %v18_v0, %v66_v5 }
  0x77   :  { %70 = vrot.lane.b32.xlu0 %v68_v6, %s756_s18 }
  0x7b   :  { %43 = vperm.xlu0 %720, %v18_v0  }
  0x82   :  { %v26_v10 = vpop.permute.xlu1 %25 }
  0x83   :  { %v32_v26 = vmax.f32 %v26_v10, %v31_v18 }
  0x87   :  { %v35_v12 = vpop.permute.xlu1 %34 }
  0x88   :  { %v41_v27 = vmax.f32 %v35_v12, %v40_v19  ;;  %v149_v19 = vld [vmem:[%s984_s1] sm:$0xff] }
  0x8c   :  { %v53_v22 = vpop.permute.xlu1 %52 }
  0x8d   :  { %v59_v28 = vmin.f32 %v53_v22, %v58_v20  ;;  %v759_v20 = vmov 1.0  }
  0x8f   :  { %v62_v30 = vsub.f32 %v59_v28, %v41_v27 }
  0x91   :  { %v63_v33 = vmax.f32 %v62_v30, 0.0  ;;  %v277_v30 = vld [vmem:[%s986_s3] sm:$0x1] }
  0xe9   :  { %v71_v7 = vpop.permute.xlu0 %70 }
  0xea   :  { %v73_v8 = vmul.f32 %v71_v7, %v68_v6 }
  0xec   :  { %79 = vperm.xlu1 %722, %v73_v8  }
  0xfa   :  { %v44_v23 = vpop.permute.xlu0 %43 }
  0xfb   :  { %v50_v29 = vmin.f32 %v44_v23, %v49_v21  ;;  %v760_v21 = vmov 1966171168  }
  0xfc   :  { %v281_v22 = vunpack.c.l.s4 %v760_v21 }
  0xfd   :  { %v60_v31 = vsub.f32 %v50_v29, %v32_v26 }
  0xfe   :  { %v282_v25 = vunpack.c.0.s8 %v281_v22 }
  0xff   :  { %v61_v34 = vmax.f32 %v60_v31, 0.0 }
 0x100   :  { %v285_v31 = vsub.s32 %v282_v25, %v791_v11 }
 0x101   :  { %v64_v37 = vmul.f32 %v63_v33, %v61_v34 }
 0x16b   :  { %v80_v36 = vpop.permute.xlu1 %79 }
 0x16c   :  { %v86_v38 = vadd.f32 %v85_v35, %v80_v36 }
 0x16e   :  { %v87_v39 = vsub.f32 %v86_v38, %v64_v37  ;;  %v278_v38 = vsub.f32 1.0, %v277_v30 }
 0x170   :  { %723 = vrcp.f32 %v87_v39 }
 0x17a   :  { %v724_v40 = vpop.eup %723 }
 0x17b   :  { %v89_v41 = vmul.f32 %v724_v40, %v87_v39 }
 0x17d   :  { %v90_v42 = vsub.f32 2.0, %v89_v41 }
 0x17f   :  { %v91_v43 = vmul.f32 %v724_v40, %v90_v42 }
 0x181   :  { %v92_v44 = vmul.f32 %v91_v43, %v64_v37 }
 0x183   :  { %114 = vmax.xlane.f32.xlu0 %v92_v44  ;;  %v97_v55 = vrot.slane %v92_v44, 4 }
 0x185   :  { %v98_v56 = vmax.f32 %v92_v44, %v97_v55 }
 0x187   :  { %v99_v57 = vrot.slane %v98_v56, 2 }
 0x189   :  { %v100_v58 = vmax.f32 %v98_v56, %v99_v57 }
 0x18b   :  { %v101_v59 = vrot.slane %v100_v58, 1 }
 0x18d   :  { %v102_v60 = vmax.f32 %v100_v58, %v101_v59 }
 0x18f   :  { %vm103_vm3 = vcmp.eq.f32.partialorder %v92_v44, %v102_v60 }
 0x190   :  { %v104_v61 = vsel %vm103_vm3, %v791_v11, 8 }
 0x191   :  { %v105_v62 = vrot.slane %v104_v61, 4 }
 0x193   :  { %vm106_vm4 = vcmp.lt.s32.totalorder %v104_v61, %v105_v62 }
 0x194   :  { %v107_v0 = vsel %vm106_vm4, %v104_v61, %v105_v62 }
 0x195   :  { %v108_v5 = vrot.slane %v107_v0, 2 }
 0x197   :  { %vm109_vm6 = vcmp.lt.s32.totalorder %v107_v0, %v108_v5 }
 0x198   :  { %v110_v9 = vsel %vm109_vm6, %v107_v0, %v108_v5 }
 0x199   :  { %v111_v13 = vrot.slane %v110_v9, 1 }
 0x19b   :  { %vm112_vm9 = vcmp.lt.s32.totalorder %v110_v9, %v111_v13 }
 0x19c   :  { %v113_v17 = vsel %vm112_vm9, %v110_v9, %v111_v13 }
 0x210   :  { %v115_v46 = vpop.xlane.xlu0 %114 }
 0x211   :  { %vm116_vm0 = vcmp.eq.f32.partialorder %v92_v44, %v115_v46 }
 0x212   :  { %v117_v47 = vsel %vm116_vm0, %v96_v45, 128  ;;  %vm252_vm0 = vcmask 1043456  }
 0x213   :  { %v119_v48 = vshra.s32 %v117_v47, 16  ;;  %v118_v50 = vand.u32 65535, %v117_v47 }
 0x215   :  { %v121_v49 = vcvt.s32.f32 %v119_v48  ;;  %v120_v52 = vcvt.s32.f32 %v118_v50 }
 0x217   :  { %122 = vmin.xlane.f32.xlu1 %v121_v49 }
 0x2a4   :  { %v123_v51 = vpop.xlane.xlu1 %122 }
 0x2a5   :  { %vm124_vm1 = vcmp.eq.f32.partialorder %v121_v49, %v123_v51  ;;  %v129_v63 = vcvt.f32.s32 %v123_v51 }
 0x2a6   :  { %v125_v53 = vsel %vm124_vm1, %v120_v52, inf  ;;  %vm233_vm1 = vcmask 1040384  }
 0x2a7   :  { %126 = vmin.xlane.f32.xlu0 %v125_v53  ;;  %v130_v3 = vshll.u32 %v129_v63, 16 }
 0x334   :  { %v127_v2 = vpop.xlane.xlu0 %126 }
 0x335   :  { %v128_v4 = vcvt.f32.s32 %v127_v2 }
 0x337   :  { %v131_v6 = vadd.s32 %v130_v3, %v128_v4 }
 0x339   :  { %vm132_vm5 = vcmp.eq.s32.totalorder %v131_v6, %v96_v45 }
 0x33a   :  { %v133_v7 = vsel %vm132_vm5, %v791_v11, 4294967295 }
 0x33b   :  { %v134_v8 = vrot.slane %v133_v7, 4 }
 0x33d   :  { %vm135_vm7 = vcmp.gt.s32.totalorder %v133_v7, %v134_v8 }
 0x33e   :  { %v136_v10 = vsel %vm135_vm7, %v133_v7, %v134_v8 }
 0x33f   :  { %v137_v12 = vrot.slane %v136_v10, 2 }
 0x341   :  { %vm138_vm8 = vcmp.gt.s32.totalorder %v136_v10, %v137_v12 }
 0x342   :  { %v139_v14 = vsel %vm138_vm8, %v136_v10, %v137_v12 }
 0x343   :  { %v140_v15 = vrot.slane %v139_v14, 1 }
 0x345   :  { %vm141_vm10 = vcmp.gt.s32.totalorder %v139_v14, %v140_v15 }
 0x346   :  { %v142_v16 = vsel %vm141_vm10, %v139_v14, %v140_v15 }
 0x347   :  { %vm143_vm11 = vcmp.ge.s32.totalorder %v142_v16, 0 }
 0x348   :  { %v144_v18 = vsel %vm143_vm11, %v142_v16, %v113_v17  ;;  %v145_v23 = vsel %vm143_vm11, 1.0, %v102_v60 }
 0x349   :  { %vm146_vm13 = vcmp.eq.s32.totalorder %v791_v11, %v144_v18  ;;  %vm224_vm14 = vcmp.lt.f32.partialorder %v145_v23, 0.5 }
 0x34a   :  { %693 = vmatpush3.msk.msra.mxu0 %vm146_vm13, %v759_v20 }
 0x34b   :  { %695 = vmatmul.mubr.msk.f32.vlgmr.msra.gmra.mrb[0].mxu0 %vm150_vm12, %v149_v19 }
 0x41e   :  { %v220_v26 = vpop.f32.mrb[0].mxu0 }
 0x41f   :  { %v225_v27 = vsel %vm224_vm14, 0.0, %v220_v26  ;;  %v250_v28 = vsub.f32 %v249_v24, %v220_v26  ;;  %v696_v29 = vpop.f32.mrb[1].mxu0 }
 0x420   :  { %vm226_vm15 = vcmp.ne.f32.partialorder %v225_v27, 0.0 }
 0x421   :  { %v657_v32 = vsel %vm226_vm15, 1.0, %v757_v54  ;;  %v251_v33 = vand.u32 2147483647, %v250_v28 }
 0x422   :  { %v229_v34 = vsub.f32 1.0, %v657_v32  ;;  %v279_v35 = vcombine.high %v657_v32, %v657_v32  ;;  %v231_v36 = vrot.slane %v657_v32, 4 }
 0x423   :  { %v253_v37 = vsel %vm252_vm0, %v251_v33, 0.0 }
 0x424   :  { %v254_v39 = vrot.slane %v253_v37, 4  ;;  %v308_v40 = vcombine.high %v229_v34, %v229_v34  ;;  %v234_v41 = vsel %vm233_vm1, %v231_v36, 0.0  ;;  %v286_v42 = vrot.slane %v279_v35, %v285_v31 }
 0x425   :  { %235 = vadd.xlane.f32.xlu0 %v234_v41 }
 0x426   :  { %v255_v43 = vadd.f32 %v254_v39, %v253_v37  ;;  %v315_v44 = vrot.slane %v308_v40, %v285_v31  ;;  %v293_v45 = vrot.slane %v286_v42, %v285_v31 }
 0x428   :  { %v256_v46 = vrot.slane %v255_v43, 2  ;;  %v322_v11 = vrot.slane %v315_v44, %v285_v31  ;;  %v823_v47 = vmul.f32 %v293_v45, %v278_v38 }
 0x42a   :  { %v825_v48 = vmul.f32 %v322_v11, %v278_v38  ;;  %v257_v49 = vadd.f32 %v256_v46, %v255_v43 }
 0x42c   :  { %vm327_vm2 = vcmp.ge.s32.totalorder %v825_v48, 1073741824  ;;  %v258_v50 = vrot.slane %v257_v49, 1 }
 0x42d   :  { %v658_v51 = vsel %vm327_vm2, 1.0, %v757_v54 }
 0x42e   :  { %v330_v52 = vsel %vm233_vm1, %v658_v51, 0.0  ;;  %v259_v53 = vadd.f32 %v258_v50, %v257_v49 }
 0x42f   :  { %331 = vadd.xlane.f32.xlu1 %v330_v52 }
 0x430   :  { %v830_v55 = vmul.f32 %v657_v32, %v259_v53 }
 0x4b2   :  { %v236_v56 = vpop.xlane.xlu0 %235 }
 0x4b3   :  { %v237_v57 = vrot.slane %v236_v56, 4 }
 0x4b5   :  { %v238_v58 = vadd.f32 %v237_v57, %v236_v56 }
 0x4b7   :  { %v239_v59 = vrot.slane %v238_v58, 2 }
 0x4b9   :  { %v240_v60 = vadd.f32 %v239_v59, %v238_v58 }
 0x4bb   :  { %v241_v61 = vrot.slane %v240_v60, 1 }
 0x4bc   :  { %v332_v2 = vpop.xlane.xlu1 %331 }
 0x4bd   :  { %v242_v62 = vadd.f32 %v241_v61, %v240_v60 }
 0x4bf   :  { %697 = vpush %v242_v62 }
 0x4f0   :  { %s698_s2 = spop %697 }
 0x4f1   :  { %v832_v63 = vstv %s698_s2 }
 0x4f2   :  { %v835_v0 = vmul.f32 3.0, %v832_v63  ;;  %725 = vrcp.f32 %v832_v63 }
 0x4f4   :  { %vm333_vm3 = vcmp.ge.f32.partialorder %v332_v2, %v835_v0 }
 0x4f5   :  { %v334_v3 = vsel %vm333_vm3, 1073741824, %v752_v1 }
 0x4f6   :  { %v335_v4 = vor.u32 536870912, %v334_v3 }
 0x4f8   :  { %vm336_vm4 = vcmp.ge.s32.totalorder %v825_v48, %v335_v4 }
 0x4f9   :  { %v659_v5 = vsel %vm336_vm4, 1.0, %v757_v54 }
 0x4fa   :  { %v339_v6 = vsel %vm233_vm1, %v659_v5, 0.0 }
 0x4fb   :  { %340 = vadd.xlane.f32.xlu0 %v339_v6 }
 0x588   :  { %v341_v7 = vpop.xlane.xlu0 %340 }
 0x589   :  { %vm342_vm5 = vcmp.ge.f32.partialorder %v341_v7, %v835_v0 }
 0x58a   :  { %v343_v8 = vsel %vm342_vm5, %v335_v4, %v334_v3 }
 0x58b   :  { %v344_v9 = vor.u32 268435456, %v343_v8 }
 0x58d   :  { %vm345_vm6 = vcmp.ge.s32.totalorder %v825_v48, %v344_v9 }
 0x58e   :  { %v660_v10 = vsel %vm345_vm6, 1.0, %v757_v54 }
 0x58f   :  { %v348_v12 = vsel %vm233_vm1, %v660_v10, 0.0 }
 0x590   :  { %349 = vadd.xlane.f32.xlu1 %v348_v12 }
 0x61d   :  { %v350_v1 = vpop.xlane.xlu1 %349 }
 0x61e   :  { %vm351_vm7 = vcmp.ge.f32.partialorder %v350_v1, %v835_v0 }
 0x61f   :  { %v352_v13 = vsel %vm351_vm7, %v344_v9, %v343_v8 }
 0x620   :  { %v353_v14 = vor.u32 134217728, %v352_v13 }
 0x622   :  { %vm354_vm8 = vcmp.ge.s32.totalorder %v825_v48, %v353_v14 }
 0x623   :  { %v661_v15 = vsel %vm354_vm8, 1.0, %v757_v54 }
 0x624   :  { %v357_v16 = vsel %vm233_vm1, %v661_v15, 0.0 }
 0x625   :  { %358 = vadd.xlane.f32.xlu0 %v357_v16 }
 0x6b2   :  { %v359_v17 = vpop.xlane.xlu0 %358 }
 0x6b3   :  { %vm360_vm9 = vcmp.ge.f32.partialorder %v359_v17, %v835_v0 }
 0x6b4   :  { %v361_v18 = vsel %vm360_vm9, %v353_v14, %v352_v13 }
 0x6b5   :  { %v362_v19 = vor.u32 67108864, %v361_v18 }
 0x6b7   :  { %vm363_vm10 = vcmp.ge.s32.totalorder %v825_v48, %v362_v19 }
 0x6b8   :  { %v662_v20 = vsel %vm363_vm10, 1.0, %v757_v54 }
 0x6b9   :  { %v366_v21 = vsel %vm233_vm1, %v662_v20, 0.0 }
 0x6ba   :  { %367 = vadd.xlane.f32.xlu1 %v366_v21 }
 0x747   :  { %v368_v22 = vpop.xlane.xlu1 %367 }
 0x748   :  { %vm369_vm11 = vcmp.ge.f32.partialorder %v368_v22, %v835_v0 }
 0x749   :  { %v370_v23 = vsel %vm369_vm11, %v362_v19, %v361_v18 }
 0x74a   :  { %v371_v24 = vor.u32 33554432, %v370_v23 }
 0x74c   :  { %vm372_vm12 = vcmp.ge.s32.totalorder %v825_v48, %v371_v24 }
 0x74d   :  { %v663_v25 = vsel %vm372_vm12, 1.0, %v757_v54 }
 0x74e   :  { %v375_v26 = vsel %vm233_vm1, %v663_v25, 0.0 }
 0x74f   :  { %376 = vadd.xlane.f32.xlu0 %v375_v26 }
 0x7dc   :  { %v377_v27 = vpop.xlane.xlu0 %376 }
 0x7dd   :  { %vm378_vm13 = vcmp.ge.f32.partialorder %v377_v27, %v835_v0 }
 0x7de   :  { %v379_v28 = vsel %vm378_vm13, %v371_v24, %v370_v23 }
 0x7df   :  { %v380_v29 = vor.u32 16777216, %v379_v28 }
 0x7e1   :  { %vm381_vm14 = vcmp.ge.s32.totalorder %v825_v48, %v380_v29 }
 0x7e2   :  { %v664_v30 = vsel %vm381_vm14, 1.0, %v757_v54 }
 0x7e3   :  { %v384_v31 = vsel %vm233_vm1, %v664_v30, 0.0 }
 0x7e4   :  { %385 = vadd.xlane.f32.xlu1 %v384_v31 }
 0x871   :  { %v386_v32 = vpop.xlane.xlu1 %385 }
 0x872   :  { %vm387_vm15 = vcmp.ge.f32.partialorder %v386_v32, %v835_v0 }
 0x873   :  { %v388_v33 = vsel %vm387_vm15, %v380_v29, %v379_v28 }
 0x874   :  { %v389_v34 = vor.u32 8388608, %v388_v33 }
 0x876   :  { %vm390_vm0 = vcmp.ge.s32.totalorder %v825_v48, %v389_v34 }
 0x877   :  { %v665_v35 = vsel %vm390_vm0, 1.0, %v757_v54 }
 0x878   :  { %v393_v36 = vsel %vm233_vm1, %v665_v35, 0.0 }
 0x879   :  { %394 = vadd.xlane.f32.xlu0 %v393_v36 }
 0x906   :  { %v395_v37 = vpop.xlane.xlu0 %394 }
 0x907   :  { %vm396_vm2 = vcmp.ge.f32.partialorder %v395_v37, %v835_v0 }
 0x908   :  { %v397_v38 = vsel %vm396_vm2, %v389_v34, %v388_v33 }
 0x909   :  { %v398_v39 = vor.u32 4194304, %v397_v38 }
 0x90b   :  { %vm399_vm3 = vcmp.ge.s32.totalorder %v825_v48, %v398_v39 }
 0x90c   :  { %v666_v40 = vsel %vm399_vm3, 1.0, %v757_v54 }
 0x90d   :  { %v402_v41 = vsel %vm233_vm1, %v666_v40, 0.0 }
 0x90e   :  { %403 = vadd.xlane.f32.xlu1 %v402_v41 }
 0x99b   :  { %v404_v42 = vpop.xlane.xlu1 %403 }
 0x99c   :  { %vm405_vm4 = vcmp.ge.f32.partialorder %v404_v42, %v835_v0 }
 0x99d   :  { %v406_v43 = vsel %vm405_vm4, %v398_v39, %v397_v38 }
 0x99e   :  { %v407_v44 = vor.u32 2097152, %v406_v43 }
 0x9a0   :  { %vm408_vm5 = vcmp.ge.s32.totalorder %v825_v48, %v407_v44 }
 0x9a1   :  { %v667_v45 = vsel %vm408_vm5, 1.0, %v757_v54 }
 0x9a2   :  { %v411_v46 = vsel %vm233_vm1, %v667_v45, 0.0 }
 0x9a3   :  { %412 = vadd.xlane.f32.xlu0 %v411_v46 }
 0xa30   :  { %v413_v11 = vpop.xlane.xlu0 %412 }
 0xa31   :  { %vm414_vm6 = vcmp.ge.f32.partialorder %v413_v11, %v835_v0 }
 0xa32   :  { %v415_v49 = vsel %vm414_vm6, %v407_v44, %v406_v43 }
 0xa33   :  { %v416_v50 = vor.u32 1048576, %v415_v49 }
 0xa35   :  { %vm417_vm7 = vcmp.ge.s32.totalorder %v825_v48, %v416_v50 }
 0xa36   :  { %v668_v51 = vsel %vm417_vm7, 1.0, %v757_v54 }
 0xa37   :  { %v420_v52 = vsel %vm233_vm1, %v668_v51, 0.0 }
 0xa38   :  { %421 = vadd.xlane.f32.xlu1 %v420_v52 }
 0xac5   :  { %v422_v53 = vpop.xlane.xlu1 %421 }
 0xac6   :  { %vm423_vm8 = vcmp.ge.f32.partialorder %v422_v53, %v835_v0 }
 0xac7   :  { %v424_v56 = vsel %vm423_vm8, %v416_v50, %v415_v49 }
 0xac8   :  { %v425_v57 = vor.u32 524288, %v424_v56 }
 0xaca   :  { %vm426_vm9 = vcmp.ge.s32.totalorder %v825_v48, %v425_v57 }
 0xacb   :  { %v669_v58 = vsel %vm426_vm9, 1.0, %v757_v54 }
 0xacc   :  { %v429_v59 = vsel %vm233_vm1, %v669_v58, 0.0 }
 0xacd   :  { %430 = vadd.xlane.f32.xlu0 %v429_v59 }
 0xb5a   :  { %v431_v60 = vpop.xlane.xlu0 %430 }
 0xb5b   :  { %vm432_vm10 = vcmp.ge.f32.partialorder %v431_v60, %v835_v0 }
 0xb5c   :  { %v433_v61 = vsel %vm432_vm10, %v425_v57, %v424_v56 }
 0xb5d   :  { %v434_v62 = vor.u32 262144, %v433_v61 }
 0xb5f   :  { %vm435_vm11 = vcmp.ge.s32.totalorder %v825_v48, %v434_v62 }
 0xb60   :  { %v670_v2 = vsel %vm435_vm11, 1.0, %v757_v54 }
 0xb61   :  { %v438_v3 = vsel %vm233_vm1, %v670_v2, 0.0 }
 0xb62   :  { %439 = vadd.xlane.f32.xlu1 %v438_v3 }
 0xbef   :  { %v440_v4 = vpop.xlane.xlu1 %439 }
 0xbf0   :  { %vm441_vm12 = vcmp.ge.f32.partialorder %v440_v4, %v835_v0 }
 0xbf1   :  { %v442_v5 = vsel %vm441_vm12, %v434_v62, %v433_v61 }
 0xbf2   :  { %v443_v6 = vor.u32 131072, %v442_v5 }
 0xbf4   :  { %vm444_vm13 = vcmp.ge.s32.totalorder %v825_v48, %v443_v6 }
 0xbf5   :  { %v671_v7 = vsel %vm444_vm13, 1.0, %v757_v54 }
 0xbf6   :  { %v447_v8 = vsel %vm233_vm1, %v671_v7, 0.0 }
 0xbf7   :  { %448 = vadd.xlane.f32.xlu0 %v447_v8 }
 0xc84   :  { %v449_v9 = vpop.xlane.xlu0 %448 }
 0xc85   :  { %vm450_vm14 = vcmp.ge.f32.partialorder %v449_v9, %v835_v0 }
 0xc86   :  { %v451_v10 = vsel %vm450_vm14, %v443_v6, %v442_v5 }
 0xc87   :  { %v452_v12 = vor.u32 65536, %v451_v10 }
 0xc89   :  { %vm453_vm15 = vcmp.ge.s32.totalorder %v825_v48, %v452_v12 }
 0xc8a   :  { %v672_v1 = vsel %vm453_vm15, 1.0, %v757_v54 }
 0xc8b   :  { %v456_v13 = vsel %vm233_vm1, %v672_v1, 0.0 }
 0xc8c   :  { %457 = vadd.xlane.f32.xlu1 %v456_v13 }
 0xd19   :  { %v458_v14 = vpop.xlane.xlu1 %457 }
 0xd1a   :  { %vm459_vm0 = vcmp.ge.f32.partialorder %v458_v14, %v835_v0 }
 0xd1b   :  { %v460_v15 = vsel %vm459_vm0, %v452_v12, %v451_v10 }
 0xd1c   :  { %v461_v16 = vor.u32 32768, %v460_v15 }
 0xd1e   :  { %vm462_vm2 = vcmp.ge.s32.totalorder %v825_v48, %v461_v16 }
 0xd1f   :  { %v673_v17 = vsel %vm462_vm2, 1.0, %v757_v54 }
 0xd20   :  { %v465_v18 = vsel %vm233_vm1, %v673_v17, 0.0 }
 0xd21   :  { %466 = vadd.xlane.f32.xlu0 %v465_v18 }
 0xdae   :  { %v467_v19 = vpop.xlane.xlu0 %466 }
 0xdaf   :  { %vm468_vm3 = vcmp.ge.f32.partialorder %v467_v19, %v835_v0 }
 0xdb0   :  { %v469_v20 = vsel %vm468_vm3, %v461_v16, %v460_v15 }
 0xdb1   :  { %v470_v21 = vor.u32 16384, %v469_v20 }
 0xdb3   :  { %vm471_vm4 = vcmp.ge.s32.totalorder %v825_v48, %v470_v21 }
 0xdb4   :  { %v674_v22 = vsel %vm471_vm4, 1.0, %v757_v54 }
 0xdb5   :  { %v474_v23 = vsel %vm233_vm1, %v674_v22, 0.0 }
 0xdb6   :  { %475 = vadd.xlane.f32.xlu1 %v474_v23 }
 0xe43   :  { %v476_v24 = vpop.xlane.xlu1 %475 }
 0xe44   :  { %vm477_vm5 = vcmp.ge.f32.partialorder %v476_v24, %v835_v0 }
 0xe45   :  { %v478_v25 = vsel %vm477_vm5, %v470_v21, %v469_v20 }
 0xe46   :  { %v479_v26 = vor.u32 8192, %v478_v25 }
 0xe48   :  { %vm480_vm6 = vcmp.ge.s32.totalorder %v825_v48, %v479_v26 }
 0xe49   :  { %v675_v27 = vsel %vm480_vm6, 1.0, %v757_v54 }
 0xe4a   :  { %v483_v28 = vsel %vm233_vm1, %v675_v27, 0.0 }
 0xe4b   :  { %484 = vadd.xlane.f32.xlu0 %v483_v28 }
 0xed8   :  { %v485_v29 = vpop.xlane.xlu0 %484 }
 0xed9   :  { %vm486_vm7 = vcmp.ge.f32.partialorder %v485_v29, %v835_v0 }
 0xeda   :  { %v487_v30 = vsel %vm486_vm7, %v479_v26, %v478_v25 }
 0xedb   :  { %v488_v31 = vor.u32 4096, %v487_v30 }
 0xedd   :  { %vm489_vm8 = vcmp.ge.s32.totalorder %v825_v48, %v488_v31 }
 0xede   :  { %v676_v32 = vsel %vm489_vm8, 1.0, %v757_v54 }
 0xedf   :  { %v492_v33 = vsel %vm233_vm1, %v676_v32, 0.0 }
 0xee0   :  { %493 = vadd.xlane.f32.xlu1 %v492_v33 }
 0xf6d   :  { %v494_v34 = vpop.xlane.xlu1 %493 }
 0xf6e   :  { %vm495_vm9 = vcmp.ge.f32.partialorder %v494_v34, %v835_v0 }
 0xf6f   :  { %v496_v35 = vsel %vm495_vm9, %v488_v31, %v487_v30  ;;  %v262_v31 = vrot.slane %v830_v55, 4 }
 0xf70   :  { %v497_v36 = vor.u32 2048, %v496_v35 }
 0xf71   :  { %v264_v32 = vsel %vm233_vm1, %v262_v31, 0.0 }
 0xf72   :  { %vm498_vm10 = vcmp.ge.s32.totalorder %v825_v48, %v497_v36 }
 0xf73   :  { %v677_v37 = vsel %vm498_vm10, 1.0, %v757_v54 }
 0xf74   :  { %v501_v38 = vsel %vm233_vm1, %v677_v37, 0.0 }
 0xf75   :  { %502 = vadd.xlane.f32.xlu0 %v501_v38 }
0x1002   :  { %v503_v39 = vpop.xlane.xlu0 %502 }
0x1003   :  { %vm504_vm11 = vcmp.ge.f32.partialorder %v503_v39, %v835_v0 }
0x1004   :  { %v505_v40 = vsel %vm504_vm11, %v497_v36, %v496_v35 }
0x1005   :  { %v506_v41 = vor.u32 1024, %v505_v40 }
0x1007   :  { %vm507_vm12 = vcmp.ge.s32.totalorder %v825_v48, %v506_v41 }
0x1008   :  { %v678_v42 = vsel %vm507_vm12, 1.0, %v757_v54 }
0x1009   :  { %v510_v43 = vsel %vm233_vm1, %v678_v42, 0.0 }
0x100a   :  { %511 = vadd.xlane.f32.xlu1 %v510_v43 }
0x1097   :  { %v512_v44 = vpop.xlane.xlu1 %511 }
0x1098   :  { %vm513_vm13 = vcmp.ge.f32.partialorder %v512_v44, %v835_v0 }
0x1099   :  { %v514_v45 = vsel %vm513_vm13, %v506_v41, %v505_v40  ;;  %v296_v41 = vsel %vm233_vm1, %v823_v47, 0.0 }
0x109a   :  { %v515_v46 = vor.u32 512, %v514_v45 }
0x109c   :  { %vm516_vm14 = vcmp.ge.s32.totalorder %v825_v48, %v515_v46 }
0x109d   :  { %v679_v11 = vsel %vm516_vm14, 1.0, %v757_v54 }
0x109e   :  { %v519_v49 = vsel %vm233_vm1, %v679_v11, 0.0 }
0x109f   :  { %520 = vadd.xlane.f32.xlu0 %v519_v49 }
0x112c   :  { %v521_v50 = vpop.xlane.xlu0 %520 }
0x112d   :  { %vm522_vm15 = vcmp.ge.f32.partialorder %v521_v50, %v835_v0 }
0x112e   :  { %v523_v51 = vsel %vm522_vm15, %v515_v46, %v514_v45 }
0x112f   :  { %v524_v52 = vor.u32 256, %v523_v51 }
0x1131   :  { %vm525_vm0 = vcmp.ge.s32.totalorder %v825_v48, %v524_v52 }
0x1132   :  { %v680_v53 = vsel %vm525_vm0, 1.0, %v757_v54 }
0x1133   :  { %v528_v56 = vsel %vm233_vm1, %v680_v53, 0.0 }
0x1134   :  { %529 = vadd.xlane.f32.xlu1 %v528_v56 }
0x11c1   :  { %v530_v57 = vpop.xlane.xlu1 %529 }
0x11c2   :  { %vm531_vm2 = vcmp.ge.f32.partialorder %v530_v57, %v835_v0 }
0x11c3   :  { %v532_v58 = vsel %vm531_vm2, %v524_v52, %v523_v51 }
0x11c4   :  { %v533_v59 = vor.u32 128, %v532_v58 }
0x11c6   :  { %vm534_vm3 = vcmp.ge.s32.totalorder %v825_v48, %v533_v59 }
0x11c7   :  { %v681_v60 = vsel %vm534_vm3, 1.0, %v757_v54 }
0x11c8   :  { %v537_v61 = vsel %vm233_vm1, %v681_v60, 0.0 }
0x11c9   :  { %538 = vadd.xlane.f32.xlu0 %v537_v61 }
0x1256   :  { %v539_v62 = vpop.xlane.xlu0 %538 }
0x1257   :  { %vm540_vm4 = vcmp.ge.f32.partialorder %v539_v62, %v835_v0 }
0x1258   :  { %v541_v2 = vsel %vm540_vm4, %v533_v59, %v532_v58 }
0x1259   :  { %v542_v3 = vor.u32 64, %v541_v2 }
0x125b   :  { %vm543_vm5 = vcmp.ge.s32.totalorder %v825_v48, %v542_v3 }
0x125c   :  { %v682_v4 = vsel %vm543_vm5, 1.0, %v757_v54 }
0x125d   :  { %v546_v5 = vsel %vm233_vm1, %v682_v4, 0.0 }
0x125e   :  { %547 = vadd.xlane.f32.xlu1 %v546_v5 }
0x12eb   :  { %v548_v6 = vpop.xlane.xlu1 %547 }
0x12ec   :  { %vm549_vm6 = vcmp.ge.f32.partialorder %v548_v6, %v835_v0 }
0x12ed   :  { %v550_v7 = vsel %vm549_vm6, %v542_v3, %v541_v2 }
0x12ee   :  { %v551_v8 = vor.u32 32, %v550_v7 }
0x12f0   :  { %vm552_vm7 = vcmp.ge.s32.totalorder %v825_v48, %v551_v8 }
0x12f1   :  { %v683_v9 = vsel %vm552_vm7, 1.0, %v757_v54 }
0x12f2   :  { %v555_v10 = vsel %vm233_vm1, %v683_v9, 0.0 }
0x12f3   :  { %556 = vadd.xlane.f32.xlu0 %v555_v10 }
0x1380   :  { %v557_v12 = vpop.xlane.xlu0 %556 }
0x1381   :  { %vm558_vm8 = vcmp.ge.f32.partialorder %v557_v12, %v835_v0  ;;  %v726_v12 = vpop.eup %725 }
0x1382   :  { %v559_v1 = vsel %vm558_vm8, %v551_v8, %v550_v7 }
0x1383   :  { %v560_v13 = vor.u32 16, %v559_v1 }
0x1385   :  { %vm561_vm9 = vcmp.ge.s32.totalorder %v825_v48, %v560_v13 }
0x1386   :  { %v684_v14 = vsel %vm561_vm9, 1.0, %v757_v54 }
0x1387   :  { %v564_v15 = vsel %vm233_vm1, %v684_v14, 0.0 }
0x1388   :  { %565 = vadd.xlane.f32.xlu1 %v564_v15 }
0x1415   :  { %v566_v16 = vpop.xlane.xlu1 %565 }
0x1416   :  { %vm567_vm10 = vcmp.ge.f32.partialorder %v566_v16, %v835_v0 }
0x1417   :  { %v568_v17 = vsel %vm567_vm10, %v560_v13, %v559_v1  ;;  %v246_v1 = vmul.f32 %v726_v12, %v832_v63 }
0x1418   :  { %v569_v18 = vor.u32 8, %v568_v17 }
0x1419   :  { %v247_v13 = vsub.f32 2.0, %v246_v1 }
0x141a   :  { %vm570_vm11 = vcmp.ge.s32.totalorder %v825_v48, %v569_v18 }
0x141b   :  { %v685_v19 = vsel %vm570_vm11, 1.0, %v757_v54  ;;  %v248_v16 = vmul.f32 %v726_v12, %v247_v13 }
0x141c   :  { %v573_v20 = vsel %vm233_vm1, %v685_v19, 0.0 }
0x141d   :  { %574 = vadd.xlane.f32.xlu0 %v573_v20 }
0x14aa   :  { %v575_v21 = vpop.xlane.xlu0 %574 }
0x14ab   :  { %vm576_vm12 = vcmp.ge.f32.partialorder %v575_v21, %v835_v0 }
0x14ac   :  { %v577_v22 = vsel %vm576_vm12, %v569_v18, %v568_v17 }
0x14ad   :  { %v578_v23 = vor.u32 4, %v577_v22 }
0x14af   :  { %vm579_vm13 = vcmp.ge.s32.totalorder %v825_v48, %v578_v23 }
0x14b0   :  { %v686_v24 = vsel %vm579_vm13, 1.0, %v757_v54 }
0x14b1   :  { %v582_v25 = vsel %vm233_vm1, %v686_v24, 0.0 }
0x14b2   :  { %583 = vadd.xlane.f32.xlu1 %v582_v25 }
0x153f   :  { %v584_v26 = vpop.xlane.xlu1 %583 }
0x1540   :  { %vm585_vm14 = vcmp.ge.f32.partialorder %v584_v26, %v835_v0 }
0x1541   :  { %v586_v27 = vsel %vm585_vm14, %v578_v23, %v577_v22  ;;  %v275_v22 = vmul.f32 0.25, %v248_v16 }
0x1542   :  { %v587_v28 = vor.u32 2, %v586_v27 }
0x1544   :  { %vm588_vm15 = vcmp.ge.s32.totalorder %v825_v48, %v587_v28 }
0x1545   :  { %v687_v29 = vsel %vm588_vm15, 1.0, %v757_v54 }
0x1546   :  { %v591_v30 = vsel %vm233_vm1, %v687_v29, 0.0 }
0x1547   :  { %592 = vadd.xlane.f32.xlu0 %v591_v30 }
0x154b   :  { %265 = vadd.xlane.f32.xlu0 %v264_v32 }
0x15d4   :  { %v593_v33 = vpop.xlane.xlu0 %592 }
0x15d5   :  { %vm594_vm0 = vcmp.ge.f32.partialorder %v593_v33, %v835_v0 }
0x15d6   :  { %v595_v34 = vsel %vm594_vm0, %v587_v28, %v586_v27 }
0x15d7   :  { %v596_v35 = vor.u32 1, %v595_v34 }
0x15d8   :  { %v266_v36 = vpop.xlane.xlu0 %265 }
0x15d9   :  { %v267_v37 = vrot.slane %v266_v36, 4  ;;  %vm597_vm2 = vcmp.ge.s32.totalorder %v825_v48, %v596_v35 }
0x15da   :  { %v688_v38 = vsel %vm597_vm2, 1.0, %v757_v54 }
0x15db   :  { %v268_v39 = vadd.f32 %v267_v37, %v266_v36  ;;  %v600_v40 = vsel %vm233_vm1, %v688_v38, 0.0 }
0x15dc   :  { %601 = vadd.xlane.f32.xlu1 %v600_v40 }
0x15dd   :  { %v269_v55 = vrot.slane %v268_v39, 2 }
0x15df   :  { %v270_v42 = vadd.f32 %v269_v55, %v268_v39 }
0x15e0   :  { %297 = vadd.xlane.f32.xlu1 %v296_v41 }
0x15e1   :  { %v271_v43 = vrot.slane %v270_v42, 1 }
0x15e3   :  { %v272_v44 = vadd.f32 %v271_v43, %v270_v42 }
0x15e5   :  { %699 = vpush %v272_v44 }
0x1616   :  { %s700_s3 = spop %699 }
0x1617   :  { %v274_v20 = vstv %s700_s3 }
0x1618   :  { %v276_v24 = vmul.f32 %v275_v22, %v274_v20 }
0x1669   :  { %v602_v45 = vpop.xlane.xlu1 %601 }
0x166a   :  { %vm603_vm3 = vcmp.ge.f32.partialorder %v602_v45, %v835_v0 }
0x166b   :  { %v604_v46 = vsel %vm603_vm3, %v596_v35, %v595_v34 }
0x166c   :  { %vm606_vm4 = vcmp.gt.f32.partialorder %v825_v48, %v604_v46 }
0x166d   :  { %v298_v11 = vpop.xlane.xlu1 %297  ;;  %v620_v49 = vsel %vm606_vm4, %v825_v48, 0.0  ;;  %v689_v50 = vsel %vm606_vm4, 1.0, %v757_v54 }
0x166e   :  { %v299_v51 = vrot.slane %v298_v11, 4  ;;  %v621_v52 = vsel %vm233_vm1, %v620_v49, 0.0  ;;  %v609_v47 = vsel %vm233_vm1, %v689_v50, 0.0  ;;  %vm638_vm1 = vcmask 0  }
0x166f   :  { %622 = vadd.xlane.f32.xlu1 %v621_v52  ;;  %610 = vadd.xlane.f32.xlu0 %v609_v47 }
0x1670   :  { %v300_v53 = vadd.f32 %v299_v51, %v298_v11 }
0x1672   :  { %v301_v56 = vrot.slane %v300_v53, 2 }
0x1674   :  { %v302_v57 = vadd.f32 %v301_v56, %v300_v53 }
0x1676   :  { %v303_v58 = vrot.slane %v302_v57, 1 }
0x1678   :  { %v304_v59 = vadd.f32 %v303_v58, %v302_v57 }
0x167a   :  { %701 = vpush %v304_v59 }
0x16ab   :  { %s702_s5 = spop %701 }
0x16ac   :  { %v306_v21 = vstv %s702_s5 }
0x16fc   :  { %v623_v60 = vpop.xlane.xlu1 %622  ;;  %v611_v61 = vpop.xlane.xlu0 %610 }
0x16fd   :  { %v624_v62 = vrot.slane %v623_v60, 4  ;;  %v612_v2 = vrot.slane %v611_v61, 4 }
0x16ff   :  { %v625_v48 = vadd.f32 %v624_v62, %v623_v60  ;;  %v613_v3 = vadd.f32 %v612_v2, %v611_v61 }
0x1701   :  { %v626_v54 = vrot.slane %v625_v48, 2  ;;  %v614_v4 = vrot.slane %v613_v3, 2 }
0x1703   :  { %v627_v5 = vadd.f32 %v626_v54, %v625_v48  ;;  %v615_v6 = vadd.f32 %v614_v4, %v613_v3 }
0x1705   :  { %v616_v7 = vrot.slane %v615_v6, 1  ;;  %v628_v8 = vrot.slane %v627_v5, 1 }
0x1707   :  { %v617_v9 = vadd.f32 %v616_v7, %v615_v6  ;;  %v629_v10 = vadd.f32 %v628_v8, %v627_v5 }
0x1709   :  { %703 = vpush %v617_v9 }
0x170a   :  { %705 = vpush %v629_v10 }
0x173a   :  { %s704_s6 = spop %703 }
0x173b   :  { %v619_v14 = vstv %s704_s6  ;;  %s706_s7 = spop %705 }
0x173c   :  { %v632_v15 = vsub.f32 %v835_v0, %v619_v14  ;;  %v631_v18 = vstv %s706_s7 }
0x173e   :  { %v633_v17 = vmul.f32 %v632_v15, %v604_v46 }
0x1740   :  { %v634_v19 = vadd.f32 %v633_v17, %v631_v18 }
0x1742   :  { %v635_v23 = vadd.f32 %v634_v19, %v306_v21 }
0x1744   :  { %v636_v63 = vmul.f32 %v635_v23, %v248_v16 }
0x1746   :  { %v637_v25 = vadd.f32 %v636_v63, %v276_v24 }
0x1748   :  { %639 = vst.msk [vmem:[#allocation2] sm:$0x1] %vm638_vm1, %v637_v25 }
0x1749   :  { %738 = shalt.err (!%p735_p4)
}
0x174a   :  { %s739_s14 = scalar_lea.hbm %s987_s4, 16 }
0x174b   :  { %p740_p5 = scmp.ne.s32.totalorder %s987_s4, %s739_s14  ;;  %p743_p6 = scmp.lt.u32.totalorder %s739_s14, %s987_s4 }
0x174d   :  { %p745_p7 = pnand %p743_p6, %p740_p5 }
0x174f   :  { %748 = shalt.err (!%p745_p7)
}
0x1750   :  { %649 = dma.vmem_to_hbm [thread:$0]  %s647_s9, 16, %s987_s4, [#allocation3]  }
0x1751   :  { %749 = dma.done.wait [#allocation3], 16  }
0x1752   :  { %750 = vsyncadd [#allocation3], 4294967280 }
0x1753   :  { %653 = vsyncpa [#allocation3], 1 }

</bundles_post_ra>
